<compile_context>
chip_gen: v6e
topology: v6e:2x2x1
jax: 0.10.0
libtpu: 0.0.40
codegen_flags: <defaults>
</compile_context>

<pallas_src>
import jax
import jax.numpy as jnp
import numpy as np
from jax.experimental import pallas as pl
from jax.experimental.pallas import tpu as pltpu

HIDDEN = 64          # true hidden size (PyTorch module)
HP = 128             # hidden padded to one full 128-lane vreg per gate
INPUT_SIZE = 1
OUTPUT_SIZE = 1


def lstm_kernel(x_ref, wih_ref, whh_ref, b_ref, wout_ref, bout_ref, out_ref):
    """x_ref: SMEM (seq_len,) f32 scalars.
    wih_ref: (1, 4*HP) f32, b_ref: (1, 4*HP) f32, whh_ref: (HP, 4*HP) bf16,
    wout_ref: (1, HP) f32, bout_ref: (1, 1) f32, out_ref: (1, 1) f32."""
    seq_len = x_ref.shape[0]

    # Small loop-invariant vectors kept live (4 vregs each).
    wih = wih_ref[...]                      # (1, 4*HP)
    bias = b_ref[...]                       # (1, 4*HP)

    h = jnp.zeros((1, HP), jnp.float32)     # zero init == PyTorch hidden_cell
    c = jnp.zeros((1, HP), jnp.float32)

    # Fully unrolled time loop (seq_len is static & small).  The only true
    # serial dependency is h_{t-1} -> matmul_t.
    for t in range(seq_len):
        # Input projection: SMEM scalar * resident vector (+ bias).  Does not
        # depend on h, so the scheduler can overlap it with the MXU matmul.
        xw_t = x_ref[t] * wih + bias                              # (1, 4*HP) f32

        # bf16 inputs, f32 accumulation; RHS streamed from VMEM each step.
        gates = xw_t + jnp.dot(h.astype(jnp.bfloat16), whh_ref[...],
                               preferred_element_type=jnp.float32)  # (1, 4*HP)

        # Each gate is a full, aligned 128-lane segment (PyTorch order i,f,g,o).
        # All elementwise math in f32.
        i_g = jax.nn.sigmoid(gates[:, 0 * HP:1 * HP])
        f_g = jax.nn.sigmoid(gates[:, 1 * HP:2 * HP])
        g_g = jnp.tanh(gates[:, 2 * HP:3 * HP])
        o_g = jax.nn.sigmoid(gates[:, 3 * HP:4 * HP])
        c = f_g * c + i_g * g_g             # padded lanes: 0.5*0 + 0.5*0 = 0
        h = o_g * jnp.tanh(c)               # padded lanes: 0.5*tanh(0)   = 0

    # Fused final Linear on the last hidden state (== predictions[-1]):
    # VPU multiply + XLU lane reduce instead of an N=1 MXU matmul.
    out = jnp.sum(h * wout_ref[...], axis=-1, keepdims=True) + bout_ref[...]
    out_ref[...] = out.astype(out_ref.dtype)


def _pad_gate_cols(w):
    """(..., 4*HIDDEN) -> (..., 4*HP): each gate's 64 values land in lanes
    0..63 of its own 128-lane segment; remaining lanes exactly zero."""
    lead = w.shape[:-1]
    w4 = w.reshape(lead + (4, HIDDEN))
    pad = [(0, 0)] * len(lead) + [(0, 0), (0, HP - HIDDEN)]
    return jnp.pad(w4, pad).reshape(lead + (4 * HP,))


def prepare_params(weight_ih, weight_hh, bias_ih, bias_hh, lin_w, lin_b):
    """Convert PyTorch-layout LSTM/Linear params to the padded kernel layout."""
    wih = _pad_gate_cols(weight_ih.T.reshape(INPUT_SIZE, 4 * HIDDEN))   # (1, 4*HP) f32
    whh = _pad_gate_cols(weight_hh.T)                                   # (H, 4*HP)
    whh = jnp.pad(whh, ((0, HP - HIDDEN), (0, 0)))                      # (HP, 4*HP)
    whh = whh.astype(jnp.bfloat16)                                      # bf16 MXU input
    b = _pad_gate_cols((bias_ih + bias_hh).reshape(1, 4 * HIDDEN))      # (1, 4*HP) f32
    wout = jnp.pad(lin_w, ((0, 0), (0, HP - HIDDEN)))                   # (1, HP) f32
    bout = lin_b.reshape(1, OUTPUT_SIZE)                                # (1, 1)
    return wih, whh, b, wout, bout


def lstm_forward(x_seq, wih, whh, b, wout, bout):
    seq_len = x_seq.shape[0]
    x = x_seq.reshape(seq_len).astype(jnp.float32)

    out = pl.pallas_call(
        lstm_kernel,
        out_shape=jax.ShapeDtypeStruct((1, OUTPUT_SIZE), jnp.float32),
        grid_spec=pltpu.PrefetchScalarGridSpec(
            num_scalar_prefetch=0,
            grid=(1,),                       # single invocation; loop is in-kernel
            in_specs=[
                pl.BlockSpec(memory_space=pltpu.MemorySpace.SMEM),    # x scalars
                pl.BlockSpec((1, 4 * HP), lambda i: (0, 0)),          # W_ih^T (padded)
                pl.BlockSpec((HP, 4 * HP), lambda i: (0, 0)),         # W_hh^T (padded, bf16)
                pl.BlockSpec((1, 4 * HP), lambda i: (0, 0)),          # bias (padded)
                pl.BlockSpec((1, HP), lambda i: (0, 0)),              # W_out row (padded)
                pl.BlockSpec((1, OUTPUT_SIZE), lambda i: (0, 0)),     # b_out
            ],
            out_specs=pl.BlockSpec((1, OUTPUT_SIZE), lambda i: (0, 0)),
        ),
        compiler_params=pltpu.CompilerParams(
            dimension_semantics=("arbitrary",)),
    )(x, wih, whh, b, wout, bout)
    return out.reshape(OUTPUT_SIZE)


def lstm_reference(x_seq, weight_ih, weight_hh, bias_ih, bias_hh, lin_w, lin_b):
    """Pure-JAX f32 reference matching torch.nn.LSTM + nn.Linear semantics."""
    H = HIDDEN
    x = x_seq.reshape(-1, 1, INPUT_SIZE).astype(jnp.float32)
    h = jnp.zeros((1, H), jnp.float32)
    c = jnp.zeros((1, H), jnp.float32)

    def step(carry, x_t):
        h, c = carry
        gates = x_t @ weight_ih.T + h @ weight_hh.T + bias_ih + bias_hh
        i = jax.nn.sigmoid(gates[:, 0 * H:1 * H])
        f = jax.nn.sigmoid(gates[:, 1 * H:2 * H])
        g = jnp.tanh(gates[:, 2 * H:3 * H])
        o = jax.nn.sigmoid(gates[:, 3 * H:4 * H])
        c = f * c + i * g
        h = o * jnp.tanh(c)
        return (h, c), h

    (_, _), hs = jax.lax.scan(step, (h, c), x)
    preds = hs.reshape(-1, H) @ lin_w.T + lin_b
    return preds[-1]


if __name__ == "__main__":
    key = jax.random.PRNGKey(0)
    k1, k2, k3, k4, k5, k6, k7 = jax.random.split(key, 7)

    seq_len = 8
    H = HIDDEN
    bound = 1.0 / np.sqrt(H)  # PyTorch default init scale

    # nn.LSTM(input_size=1, hidden=64) parameters (gate order i,f,g,o)
    weight_ih = jax.random.uniform(k1, (4 * H, INPUT_SIZE), jnp.float32, -bound, bound)
    weight_hh = jax.random.uniform(k2, (4 * H, H), jnp.float32, -bound, bound)
    bias_ih = jax.random.uniform(k3, (4 * H,), jnp.float32, -bound, bound)
    bias_hh = jax.random.uniform(k4, (4 * H,), jnp.float32, -bound, bound)
    # nn.Linear(64, 1)
    lin_w = jax.random.uniform(k5, (OUTPUT_SIZE, H), jnp.float32, -bound, bound)
    lin_b = jax.random.uniform(k6, (OUTPUT_SIZE,), jnp.float32, -bound, bound)

    x_seq = jax.random.normal(k7, (seq_len,), jnp.float32)

    wih, whh, b, wout, bout = prepare_params(
        weight_ih, weight_hh, bias_ih, bias_hh, lin_w, lin_b)

    pred = lstm_forward(x_seq, wih, whh, b, wout, bout)
    jax.block_until_ready(pred)

    ref = lstm_reference(x_seq, weight_ih, weight_hh, bias_ih, bias_hh, lin_w, lin_b)
    # bf16 matmul inputs (f32 accumulation) over an 8-step recurrence: compare
    # against the pure-f32 reference with a correspondingly relaxed tolerance.
    np.testing.assert_allclose(np.asarray(pred), np.asarray(ref),
                               rtol=2e-2, atol=2e-2)

    print("KERNEL_OK")
</pallas_src>

<mosaic_0001>
module attributes {stable_mosaic.version = 11 : i64} {
  func.func @lstm_kernel(%arg0: i32, %arg1: memref<8xf32, #tpu.memory_space<smem>>, %arg2: memref<1x512xf32, #tpu.memory_space<vmem>>, %arg3: memref<128x512xbf16, #tpu.memory_space<vmem>>, %arg4: memref<1x512xf32, #tpu.memory_space<vmem>>, %arg5: memref<1x128xf32, #tpu.memory_space<vmem>>, %arg6: memref<1x1xf32, #tpu.memory_space<vmem>>, %arg7: memref<1x1xf32, #tpu.memory_space<vmem>>) attributes {dimension_semantics = [#tpu.dimension_semantics<arbitrary>], iteration_bounds = array<i64: 1>, scalar_prefetch = 0 : i64, scratch_operands = 0 : i64, tpu.core_type = #tpu.core_type<tc>, window_params = [{transform_indices = @transform_0, window_bounds = array<i64: 8>}, {pipeline_mode = #tpu.pipeline_mode<synchronous>, transform_indices = @transform_1, window_bounds = array<i64: 1, 512>}, {pipeline_mode = #tpu.pipeline_mode<synchronous>, transform_indices = @transform_2, window_bounds = array<i64: 128, 512>}, {pipeline_mode = #tpu.pipeline_mode<synchronous>, transform_indices = @transform_3, window_bounds = array<i64: 1, 512>}, {pipeline_mode = #tpu.pipeline_mode<synchronous>, transform_indices = @transform_4, window_bounds = array<i64: 1, 128>}, {pipeline_mode = #tpu.pipeline_mode<synchronous>, transform_indices = @transform_5, window_bounds = array<i64: 1, 1>}, {pipeline_mode = #tpu.pipeline_mode<synchronous>, transform_indices = @transform_6, window_bounds = array<i64: 1, 1>}]} {
    %c0 = arith.constant 0 : index
    %c0_0 = arith.constant 0 : index
    %0 = vector.load %arg2[%c0, %c0_0] : memref<1x512xf32, #tpu.memory_space<vmem>>, vector<1x512xf32>
    %c0_1 = arith.constant 0 : index
    %c0_2 = arith.constant 0 : index
    %1 = vector.load %arg4[%c0_1, %c0_2] : memref<1x512xf32, #tpu.memory_space<vmem>>, vector<1x512xf32>
    %cst = arith.constant 0.000000e+00 : f32
    %2 = vector.broadcast %cst : f32 to vector<1x128xf32>
    %cst_3 = arith.constant 0.000000e+00 : f32
    %3 = vector.broadcast %cst_3 : f32 to vector<1x128xf32>
    %c0_4 = arith.constant 0 : index
    %4 = memref.load %arg1[%c0_4] : memref<8xf32, #tpu.memory_space<smem>>
    %5 = vector.broadcast %4 : f32 to vector<1x512xf32>
    %6 = arith.mulf %5, %0 : vector<1x512xf32>
    %7 = arith.addf %6, %1 : vector<1x512xf32>
    %8 = arith.truncf %2 : vector<1x128xf32> to vector<1x128xbf16>
    %c0_5 = arith.constant 0 : index
    %c0_6 = arith.constant 0 : index
    %9 = vector.load %arg3[%c0_5, %c0_6] : memref<128x512xbf16, #tpu.memory_space<vmem>>, vector<128x512xbf16>
    %cst_7 = arith.constant dense<0.000000e+00> : vector<1x512xf32>
    %10 = tpu.matmul %8, %9, %cst_7 {dimension_numbers = #tpu.dot_dimension_numbers<[1], [0], [0], [1], [0, 0, 1, 1], [], []>} : vector<1x128xbf16>, vector<128x512xbf16>, vector<1x512xf32> -> vector<1x512xf32>
    %11 = arith.addf %7, %10 : vector<1x512xf32>
    %12 = vector.extract_strided_slice %11 {offsets = [0, 0], sizes = [1, 128], strides = [1, 1]} : vector<1x512xf32> to vector<1x128xf32>
    %13 = arith.negf %12 : vector<1x128xf32>
    %14 = math.exp %13 : vector<1x128xf32>
    %cst_8 = arith.constant 1.000000e+00 : f32
    %15 = vector.broadcast %cst_8 : f32 to vector<1x128xf32>
    %16 = arith.addf %15, %14 : vector<1x128xf32>
    %17 = arith.divf %15, %16 : vector<1x128xf32>
    %18 = vector.extract_strided_slice %11 {offsets = [0, 128], sizes = [1, 128], strides = [1, 1]} : vector<1x512xf32> to vector<1x128xf32>
    %19 = arith.negf %18 : vector<1x128xf32>
    %20 = math.exp %19 : vector<1x128xf32>
    %cst_9 = arith.constant 1.000000e+00 : f32
    %21 = vector.broadcast %cst_9 : f32 to vector<1x128xf32>
    %22 = arith.addf %21, %20 : vector<1x128xf32>
    %23 = arith.divf %21, %22 : vector<1x128xf32>
    %24 = vector.extract_strided_slice %11 {offsets = [0, 256], sizes = [1, 128], strides = [1, 1]} : vector<1x512xf32> to vector<1x128xf32>
    %25 = math.tanh %24 : vector<1x128xf32>
    %26 = vector.extract_strided_slice %11 {offsets = [0, 384], sizes = [1, 128], strides = [1, 1]} : vector<1x512xf32> to vector<1x128xf32>
    %27 = arith.negf %26 : vector<1x128xf32>
    %28 = math.exp %27 : vector<1x128xf32>
    %cst_10 = arith.constant 1.000000e+00 : f32
    %29 = vector.broadcast %cst_10 : f32 to vector<1x128xf32>
    %30 = arith.addf %29, %28 : vector<1x128xf32>
    %31 = arith.divf %29, %30 : vector<1x128xf32>
    %32 = arith.mulf %23, %3 : vector<1x128xf32>
    %33 = arith.mulf %17, %25 : vector<1x128xf32>
    %34 = arith.addf %32, %33 : vector<1x128xf32>
    %35 = math.tanh %34 : vector<1x128xf32>
    %36 = arith.mulf %31, %35 : vector<1x128xf32>
    %c1 = arith.constant 1 : index
    %37 = memref.load %arg1[%c1] : memref<8xf32, #tpu.memory_space<smem>>
    %38 = vector.broadcast %37 : f32 to vector<1x512xf32>
    %39 = arith.mulf %38, %0 : vector<1x512xf32>
    %40 = arith.addf %39, %1 : vector<1x512xf32>
    %41 = arith.truncf %36 : vector<1x128xf32> to vector<1x128xbf16>
    %c0_11 = arith.constant 0 : index
    %c0_12 = arith.constant 0 : index
    %42 = vector.load %arg3[%c0_11, %c0_12] : memref<128x512xbf16, #tpu.memory_space<vmem>>, vector<128x512xbf16>
    %cst_13 = arith.constant dense<0.000000e+00> : vector<1x512xf32>
    %43 = tpu.matmul %41, %42, %cst_13 {dimension_numbers = #tpu.dot_dimension_numbers<[1], [0], [0], [1], [0, 0, 1, 1], [], []>} : vector<1x128xbf16>, vector<128x512xbf16>, vector<1x512xf32> -> vector<1x512xf32>
    %44 = arith.addf %40, %43 : vector<1x512xf32>
    %45 = vector.extract_strided_slice %44 {offsets = [0, 0], sizes = [1, 128], strides = [1, 1]} : vector<1x512xf32> to vector<1x128xf32>
    %46 = arith.negf %45 : vector<1x128xf32>
    %47 = math.exp %46 : vector<1x128xf32>
    %cst_14 = arith.constant 1.000000e+00 : f32
    %48 = vector.broadcast %cst_14 : f32 to vector<1x128xf32>
    %49 = arith.addf %48, %47 : vector<1x128xf32>
    %50 = arith.divf %48, %49 : vector<1x128xf32>
    %51 = vector.extract_strided_slice %44 {offsets = [0, 128], sizes = [1, 128], strides = [1, 1]} : vector<1x512xf32> to vector<1x128xf32>
    %52 = arith.negf %51 : vector<1x128xf32>
    %53 = math.exp %52 : vector<1x128xf32>
    %cst_15 = arith.constant 1.000000e+00 : f32
    %54 = vector.broadcast %cst_15 : f32 to vector<1x128xf32>
    %55 = arith.addf %54, %53 : vector<1x128xf32>
    %56 = arith.divf %54, %55 : vector<1x128xf32>
    %57 = vector.extract_strided_slice %44 {offsets = [0, 256], sizes = [1, 128], strides = [1, 1]} : vector<1x512xf32> to vector<1x128xf32>
    %58 = math.tanh %57 : vector<1x128xf32>
    %59 = vector.extract_strided_slice %44 {offsets = [0, 384], sizes = [1, 128], strides = [1, 1]} : vector<1x512xf32> to vector<1x128xf32>
    %60 = arith.negf %59 : vector<1x128xf32>
    %61 = math.exp %60 : vector<1x128xf32>
    %cst_16 = arith.constant 1.000000e+00 : f32
    %62 = vector.broadcast %cst_16 : f32 to vector<1x128xf32>
    %63 = arith.addf %62, %61 : vector<1x128xf32>
    %64 = arith.divf %62, %63 : vector<1x128xf32>
    %65 = arith.mulf %56, %34 : vector<1x128xf32>
    %66 = arith.mulf %50, %58 : vector<1x128xf32>
    %67 = arith.addf %65, %66 : vector<1x128xf32>
    %68 = math.tanh %67 : vector<1x128xf32>
    %69 = arith.mulf %64, %68 : vector<1x128xf32>
    %c2 = arith.constant 2 : index
    %70 = memref.load %arg1[%c2] : memref<8xf32, #tpu.memory_space<smem>>
    %71 = vector.broadcast %70 : f32 to vector<1x512xf32>
    %72 = arith.mulf %71, %0 : vector<1x512xf32>
    %73 = arith.addf %72, %1 : vector<1x512xf32>
    %74 = arith.truncf %69 : vector<1x128xf32> to vector<1x128xbf16>
    %c0_17 = arith.constant 0 : index
    %c0_18 = arith.constant 0 : index
    %75 = vector.load %arg3[%c0_17, %c0_18] : memref<128x512xbf16, #tpu.memory_space<vmem>>, vector<128x512xbf16>
    %cst_19 = arith.constant dense<0.000000e+00> : vector<1x512xf32>
    %76 = tpu.matmul %74, %75, %cst_19 {dimension_numbers = #tpu.dot_dimension_numbers<[1], [0], [0], [1], [0, 0, 1, 1], [], []>} : vector<1x128xbf16>, vector<128x512xbf16>, vector<1x512xf32> -> vector<1x512xf32>
    %77 = arith.addf %73, %76 : vector<1x512xf32>
    %78 = vector.extract_strided_slice %77 {offsets = [0, 0], sizes = [1, 128], strides = [1, 1]} : vector<1x512xf32> to vector<1x128xf32>
    %79 = arith.negf %78 : vector<1x128xf32>
    %80 = math.exp %79 : vector<1x128xf32>
    %cst_20 = arith.constant 1.000000e+00 : f32
    %81 = vector.broadcast %cst_20 : f32 to vector<1x128xf32>
    %82 = arith.addf %81, %80 : vector<1x128xf32>
    %83 = arith.divf %81, %82 : vector<1x128xf32>
    %84 = vector.extract_strided_slice %77 {offsets = [0, 128], sizes = [1, 128], strides = [1, 1]} : vector<1x512xf32> to vector<1x128xf32>
    %85 = arith.negf %84 : vector<1x128xf32>
    %86 = math.exp %85 : vector<1x128xf32>
    %cst_21 = arith.constant 1.000000e+00 : f32
    %87 = vector.broadcast %cst_21 : f32 to vector<1x128xf32>
    %88 = arith.addf %87, %86 : vector<1x128xf32>
    %89 = arith.divf %87, %88 : vector<1x128xf32>
    %90 = vector.extract_strided_slice %77 {offsets = [0, 256], sizes = [1, 128], strides = [1, 1]} : vector<1x512xf32> to vector<1x128xf32>
    %91 = math.tanh %90 : vector<1x128xf32>
    %92 = vector.extract_strided_slice %77 {offsets = [0, 384], sizes = [1, 128], strides = [1, 1]} : vector<1x512xf32> to vector<1x128xf32>
    %93 = arith.negf %92 : vector<1x128xf32>
    %94 = math.exp %93 : vector<1x128xf32>
    %cst_22 = arith.constant 1.000000e+00 : f32
    %95 = vector.broadcast %cst_22 : f32 to vector<1x128xf32>
    %96 = arith.addf %95, %94 : vector<1x128xf32>
    %97 = arith.divf %95, %96 : vector<1x128xf32>
    %98 = arith.mulf %89, %67 : vector<1x128xf32>
    %99 = arith.mulf %83, %91 : vector<1x128xf32>
    %100 = arith.addf %98, %99 : vector<1x128xf32>
    %101 = math.tanh %100 : vector<1x128xf32>
    %102 = arith.mulf %97, %101 : vector<1x128xf32>
    %c3 = arith.constant 3 : index
    %103 = memref.load %arg1[%c3] : memref<8xf32, #tpu.memory_space<smem>>
    %104 = vector.broadcast %103 : f32 to vector<1x512xf32>
    %105 = arith.mulf %104, %0 : vector<1x512xf32>
    %106 = arith.addf %105, %1 : vector<1x512xf32>
    %107 = arith.truncf %102 : vector<1x128xf32> to vector<1x128xbf16>
    %c0_23 = arith.constant 0 : index
    %c0_24 = arith.constant 0 : index
    %108 = vector.load %arg3[%c0_23, %c0_24] : memref<128x512xbf16, #tpu.memory_space<vmem>>, vector<128x512xbf16>
    %cst_25 = arith.constant dense<0.000000e+00> : vector<1x512xf32>
    %109 = tpu.matmul %107, %108, %cst_25 {dimension_numbers = #tpu.dot_dimension_numbers<[1], [0], [0], [1], [0, 0, 1, 1], [], []>} : vector<1x128xbf16>, vector<128x512xbf16>, vector<1x512xf32> -> vector<1x512xf32>
    %110 = arith.addf %106, %109 : vector<1x512xf32>
    %111 = vector.extract_strided_slice %110 {offsets = [0, 0], sizes = [1, 128], strides = [1, 1]} : vector<1x512xf32> to vector<1x128xf32>
    %112 = arith.negf %111 : vector<1x128xf32>
    %113 = math.exp %112 : vector<1x128xf32>
    %cst_26 = arith.constant 1.000000e+00 : f32
    %114 = vector.broadcast %cst_26 : f32 to vector<1x128xf32>
    %115 = arith.addf %114, %113 : vector<1x128xf32>
    %116 = arith.divf %114, %115 : vector<1x128xf32>
    %117 = vector.extract_strided_slice %110 {offsets = [0, 128], sizes = [1, 128], strides = [1, 1]} : vector<1x512xf32> to vector<1x128xf32>
    %118 = arith.negf %117 : vector<1x128xf32>
    %119 = math.exp %118 : vector<1x128xf32>
    %cst_27 = arith.constant 1.000000e+00 : f32
    %120 = vector.broadcast %cst_27 : f32 to vector<1x128xf32>
    %121 = arith.addf %120, %119 : vector<1x128xf32>
    %122 = arith.divf %120, %121 : vector<1x128xf32>
    %123 = vector.extract_strided_slice %110 {offsets = [0, 256], sizes = [1, 128], strides = [1, 1]} : vector<1x512xf32> to vector<1x128xf32>
    %124 = math.tanh %123 : vector<1x128xf32>
    %125 = vector.extract_strided_slice %110 {offsets = [0, 384], sizes = [1, 128], strides = [1, 1]} : vector<1x512xf32> to vector<1x128xf32>
    %126 = arith.negf %125 : vector<1x128xf32>
    %127 = math.exp %126 : vector<1x128xf32>
    %cst_28 = arith.constant 1.000000e+00 : f32
    %128 = vector.broadcast %cst_28 : f32 to vector<1x128xf32>
    %129 = arith.addf %128, %127 : vector<1x128xf32>
    %130 = arith.divf %128, %129 : vector<1x128xf32>
    %131 = arith.mulf %122, %100 : vector<1x128xf32>
    %132 = arith.mulf %116, %124 : vector<1x128xf32>
    %133 = arith.addf %131, %132 : vector<1x128xf32>
    %134 = math.tanh %133 : vector<1x128xf32>
    %135 = arith.mulf %130, %134 : vector<1x128xf32>
    %c4 = arith.constant 4 : index
    %136 = memref.load %arg1[%c4] : memref<8xf32, #tpu.memory_space<smem>>
    %137 = vector.broadcast %136 : f32 to vector<1x512xf32>
    %138 = arith.mulf %137, %0 : vector<1x512xf32>
    %139 = arith.addf %138, %1 : vector<1x512xf32>
    %140 = arith.truncf %135 : vector<1x128xf32> to vector<1x128xbf16>
    %c0_29 = arith.constant 0 : index
    %c0_30 = arith.constant 0 : index
    %141 = vector.load %arg3[%c0_29, %c0_30] : memref<128x512xbf16, #tpu.memory_space<vmem>>, vector<128x512xbf16>
    %cst_31 = arith.constant dense<0.000000e+00> : vector<1x512xf32>
    %142 = tpu.matmul %140, %141, %cst_31 {dimension_numbers = #tpu.dot_dimension_numbers<[1], [0], [0], [1], [0, 0, 1, 1], [], []>} : vector<1x128xbf16>, vector<128x512xbf16>, vector<1x512xf32> -> vector<1x512xf32>
    %143 = arith.addf %139, %142 : vector<1x512xf32>
    %144 = vector.extract_strided_slice %143 {offsets = [0, 0], sizes = [1, 128], strides = [1, 1]} : vector<1x512xf32> to vector<1x128xf32>
    %145 = arith.negf %144 : vector<1x128xf32>
    %146 = math.exp %145 : vector<1x128xf32>
    %cst_32 = arith.constant 1.000000e+00 : f32
    %147 = vector.broadcast %cst_32 : f32 to vector<1x128xf32>
    %148 = arith.addf %147, %146 : vector<1x128xf32>
    %149 = arith.divf %147, %148 : vector<1x128xf32>
    %150 = vector.extract_strided_slice %143 {offsets = [0, 128], sizes = [1, 128], strides = [1, 1]} : vector<1x512xf32> to vector<1x128xf32>
    %151 = arith.negf %150 : vector<1x128xf32>
    %152 = math.exp %151 : vector<1x128xf32>
    %cst_33 = arith.constant 1.000000e+00 : f32
    %153 = vector.broadcast %cst_33 : f32 to vector<1x128xf32>
    %154 = arith.addf %153, %152 : vector<1x128xf32>
    %155 = arith.divf %153, %154 : vector<1x128xf32>
    %156 = vector.extract_strided_slice %143 {offsets = [0, 256], sizes = [1, 128], strides = [1, 1]} : vector<1x512xf32> to vector<1x128xf32>
    %157 = math.tanh %156 : vector<1x128xf32>
    %158 = vector.extract_strided_slice %143 {offsets = [0, 384], sizes = [1, 128], strides = [1, 1]} : vector<1x512xf32> to vector<1x128xf32>
    %159 = arith.negf %158 : vector<1x128xf32>
    %160 = math.exp %159 : vector<1x128xf32>
    %cst_34 = arith.constant 1.000000e+00 : f32
    %161 = vector.broadcast %cst_34 : f32 to vector<1x128xf32>
    %162 = arith.addf %161, %160 : vector<1x128xf32>
    %163 = arith.divf %161, %162 : vector<1x128xf32>
    %164 = arith.mulf %155, %133 : vector<1x128xf32>
    %165 = arith.mulf %149, %157 : vector<1x128xf32>
    %166 = arith.addf %164, %165 : vector<1x128xf32>
    %167 = math.tanh %166 : vector<1x128xf32>
    %168 = arith.mulf %163, %167 : vector<1x128xf32>
    %c5 = arith.constant 5 : index
    %169 = memref.load %arg1[%c5] : memref<8xf32, #tpu.memory_space<smem>>
    %170 = vector.broadcast %169 : f32 to vector<1x512xf32>
    %171 = arith.mulf %170, %0 : vector<1x512xf32>
    %172 = arith.addf %171, %1 : vector<1x512xf32>
    %173 = arith.truncf %168 : vector<1x128xf32> to vector<1x128xbf16>
    %c0_35 = arith.constant 0 : index
    %c0_36 = arith.constant 0 : index
    %174 = vector.load %arg3[%c0_35, %c0_36] : memref<128x512xbf16, #tpu.memory_space<vmem>>, vector<128x512xbf16>
    %cst_37 = arith.constant dense<0.000000e+00> : vector<1x512xf32>
    %175 = tpu.matmul %173, %174, %cst_37 {dimension_numbers = #tpu.dot_dimension_numbers<[1], [0], [0], [1], [0, 0, 1, 1], [], []>} : vector<1x128xbf16>, vector<128x512xbf16>, vector<1x512xf32> -> vector<1x512xf32>
    %176 = arith.addf %172, %175 : vector<1x512xf32>
    %177 = vector.extract_strided_slice %176 {offsets = [0, 0], sizes = [1, 128], strides = [1, 1]} : vector<1x512xf32> to vector<1x128xf32>
    %178 = arith.negf %177 : vector<1x128xf32>
    %179 = math.exp %178 : vector<1x128xf32>
    %cst_38 = arith.constant 1.000000e+00 : f32
    %180 = vector.broadcast %cst_38 : f32 to vector<1x128xf32>
    %181 = arith.addf %180, %179 : vector<1x128xf32>
    %182 = arith.divf %180, %181 : vector<1x128xf32>
    %183 = vector.extract_strided_slice %176 {offsets = [0, 128], sizes = [1, 128], strides = [1, 1]} : vector<1x512xf32> to vector<1x128xf32>
    %184 = arith.negf %183 : vector<1x128xf32>
    %185 = math.exp %184 : vector<1x128xf32>
    %cst_39 = arith.constant 1.000000e+00 : f32
    %186 = vector.broadcast %cst_39 : f32 to vector<1x128xf32>
    %187 = arith.addf %186, %185 : vector<1x128xf32>
    %188 = arith.divf %186, %187 : vector<1x128xf32>
    %189 = vector.extract_strided_slice %176 {offsets = [0, 256], sizes = [1, 128], strides = [1, 1]} : vector<1x512xf32> to vector<1x128xf32>
    %190 = math.tanh %189 : vector<1x128xf32>
    %191 = vector.extract_strided_slice %176 {offsets = [0, 384], sizes = [1, 128], strides = [1, 1]} : vector<1x512xf32> to vector<1x128xf32>
    %192 = arith.negf %191 : vector<1x128xf32>
    %193 = math.exp %192 : vector<1x128xf32>
    %cst_40 = arith.constant 1.000000e+00 : f32
    %194 = vector.broadcast %cst_40 : f32 to vector<1x128xf32>
    %195 = arith.addf %194, %193 : vector<1x128xf32>
    %196 = arith.divf %194, %195 : vector<1x128xf32>
    %197 = arith.mulf %188, %166 : vector<1x128xf32>
    %198 = arith.mulf %182, %190 : vector<1x128xf32>
    %199 = arith.addf %197, %198 : vector<1x128xf32>
    %200 = math.tanh %199 : vector<1x128xf32>
    %201 = arith.mulf %196, %200 : vector<1x128xf32>
    %c6 = arith.constant 6 : index
    %202 = memref.load %arg1[%c6] : memref<8xf32, #tpu.memory_space<smem>>
    %203 = vector.broadcast %202 : f32 to vector<1x512xf32>
    %204 = arith.mulf %203, %0 : vector<1x512xf32>
    %205 = arith.addf %204, %1 : vector<1x512xf32>
    %206 = arith.truncf %201 : vector<1x128xf32> to vector<1x128xbf16>
    %c0_41 = arith.constant 0 : index
    %c0_42 = arith.constant 0 : index
    %207 = vector.load %arg3[%c0_41, %c0_42] : memref<128x512xbf16, #tpu.memory_space<vmem>>, vector<128x512xbf16>
    %cst_43 = arith.constant dense<0.000000e+00> : vector<1x512xf32>
    %208 = tpu.matmul %206, %207, %cst_43 {dimension_numbers = #tpu.dot_dimension_numbers<[1], [0], [0], [1], [0, 0, 1, 1], [], []>} : vector<1x128xbf16>, vector<128x512xbf16>, vector<1x512xf32> -> vector<1x512xf32>
    %209 = arith.addf %205, %208 : vector<1x512xf32>
    %210 = vector.extract_strided_slice %209 {offsets = [0, 0], sizes = [1, 128], strides = [1, 1]} : vector<1x512xf32> to vector<1x128xf32>
    %211 = arith.negf %210 : vector<1x128xf32>
    %212 = math.exp %211 : vector<1x128xf32>
    %cst_44 = arith.constant 1.000000e+00 : f32
    %213 = vector.broadcast %cst_44 : f32 to vector<1x128xf32>
    %214 = arith.addf %213, %212 : vector<1x128xf32>
    %215 = arith.divf %213, %214 : vector<1x128xf32>
    %216 = vector.extract_strided_slice %209 {offsets = [0, 128], sizes = [1, 128], strides = [1, 1]} : vector<1x512xf32> to vector<1x128xf32>
    %217 = arith.negf %216 : vector<1x128xf32>
    %218 = math.exp %217 : vector<1x128xf32>
    %cst_45 = arith.constant 1.000000e+00 : f32
    %219 = vector.broadcast %cst_45 : f32 to vector<1x128xf32>
    %220 = arith.addf %219, %218 : vector<1x128xf32>
    %221 = arith.divf %219, %220 : vector<1x128xf32>
    %222 = vector.extract_strided_slice %209 {offsets = [0, 256], sizes = [1, 128], strides = [1, 1]} : vector<1x512xf32> to vector<1x128xf32>
    %223 = math.tanh %222 : vector<1x128xf32>
    %224 = vector.extract_strided_slice %209 {offsets = [0, 384], sizes = [1, 128], strides = [1, 1]} : vector<1x512xf32> to vector<1x128xf32>
    %225 = arith.negf %224 : vector<1x128xf32>
    %226 = math.exp %225 : vector<1x128xf32>
    %cst_46 = arith.constant 1.000000e+00 : f32
    %227 = vector.broadcast %cst_46 : f32 to vector<1x128xf32>
    %228 = arith.addf %227, %226 : vector<1x128xf32>
    %229 = arith.divf %227, %228 : vector<1x128xf32>
    %230 = arith.mulf %221, %199 : vector<1x128xf32>
    %231 = arith.mulf %215, %223 : vector<1x128xf32>
    %232 = arith.addf %230, %231 : vector<1x128xf32>
    %233 = math.tanh %232 : vector<1x128xf32>
    %234 = arith.mulf %229, %233 : vector<1x128xf32>
    %c7 = arith.constant 7 : index
    %235 = memref.load %arg1[%c7] : memref<8xf32, #tpu.memory_space<smem>>
    %236 = vector.broadcast %235 : f32 to vector<1x512xf32>
    %237 = arith.mulf %236, %0 : vector<1x512xf32>
    %238 = arith.addf %237, %1 : vector<1x512xf32>
    %239 = arith.truncf %234 : vector<1x128xf32> to vector<1x128xbf16>
    %c0_47 = arith.constant 0 : index
    %c0_48 = arith.constant 0 : index
    %240 = vector.load %arg3[%c0_47, %c0_48] : memref<128x512xbf16, #tpu.memory_space<vmem>>, vector<128x512xbf16>
    %cst_49 = arith.constant dense<0.000000e+00> : vector<1x512xf32>
    %241 = tpu.matmul %239, %240, %cst_49 {dimension_numbers = #tpu.dot_dimension_numbers<[1], [0], [0], [1], [0, 0, 1, 1], [], []>} : vector<1x128xbf16>, vector<128x512xbf16>, vector<1x512xf32> -> vector<1x512xf32>
    %242 = arith.addf %238, %241 : vector<1x512xf32>
    %243 = vector.extract_strided_slice %242 {offsets = [0, 0], sizes = [1, 128], strides = [1, 1]} : vector<1x512xf32> to vector<1x128xf32>
    %244 = arith.negf %243 : vector<1x128xf32>
    %245 = math.exp %244 : vector<1x128xf32>
    %cst_50 = arith.constant 1.000000e+00 : f32
    %246 = vector.broadcast %cst_50 : f32 to vector<1x128xf32>
    %247 = arith.addf %246, %245 : vector<1x128xf32>
    %248 = arith.divf %246, %247 : vector<1x128xf32>
    %249 = vector.extract_strided_slice %242 {offsets = [0, 128], sizes = [1, 128], strides = [1, 1]} : vector<1x512xf32> to vector<1x128xf32>
    %250 = arith.negf %249 : vector<1x128xf32>
    %251 = math.exp %250 : vector<1x128xf32>
    %cst_51 = arith.constant 1.000000e+00 : f32
    %252 = vector.broadcast %cst_51 : f32 to vector<1x128xf32>
    %253 = arith.addf %252, %251 : vector<1x128xf32>
    %254 = arith.divf %252, %253 : vector<1x128xf32>
    %255 = vector.extract_strided_slice %242 {offsets = [0, 256], sizes = [1, 128], strides = [1, 1]} : vector<1x512xf32> to vector<1x128xf32>
    %256 = math.tanh %255 : vector<1x128xf32>
    %257 = vector.extract_strided_slice %242 {offsets = [0, 384], sizes = [1, 128], strides = [1, 1]} : vector<1x512xf32> to vector<1x128xf32>
    %258 = arith.negf %257 : vector<1x128xf32>
    %259 = math.exp %258 : vector<1x128xf32>
    %cst_52 = arith.constant 1.000000e+00 : f32
    %260 = vector.broadcast %cst_52 : f32 to vector<1x128xf32>
    %261 = arith.addf %260, %259 : vector<1x128xf32>
    %262 = arith.divf %260, %261 : vector<1x128xf32>
    %263 = arith.mulf %254, %232 : vector<1x128xf32>
    %264 = arith.mulf %248, %256 : vector<1x128xf32>
    %265 = arith.addf %263, %264 : vector<1x128xf32>
    %266 = math.tanh %265 : vector<1x128xf32>
    %267 = arith.mulf %262, %266 : vector<1x128xf32>
    %c0_53 = arith.constant 0 : index
    %c0_54 = arith.constant 0 : index
    %268 = vector.load %arg5[%c0_53, %c0_54] : memref<1x128xf32, #tpu.memory_space<vmem>>, vector<1x128xf32>
    %269 = arith.mulf %267, %268 : vector<1x128xf32>
    %cst_55 = arith.constant dense<0.000000e+00> : vector<1xf32>
    %270 = vector.multi_reduction <add>, %269, %cst_55 [1] : vector<1x128xf32> to vector<1xf32>
    %271 = vector.shape_cast %270 : vector<1xf32> to vector<1x1xf32>
    %c0_56 = arith.constant 0 : index
    %c0_57 = arith.constant 0 : index
    %272 = vector.load %arg6[%c0_56, %c0_57] : memref<1x1xf32, #tpu.memory_space<vmem>>, vector<1x1xf32>
    %273 = arith.addf %271, %272 : vector<1x1xf32>
    %c0_58 = arith.constant 0 : index
    %c0_59 = arith.constant 0 : index
    %274 = vector.load %arg7[%c0_58, %c0_59] : memref<1x1xf32, #tpu.memory_space<vmem>>, vector<1x1xf32>
    tpu.vector_store %arg7[%c0_58, %c0_59], %273 {strides = array<i32>} : memref<1x1xf32, #tpu.memory_space<vmem>>, vector<1x1xf32>,
    return
  }
  func.func @transform_0(%arg0: i32) -> i32 {
    %c0_i32 = arith.constant 0 : i32
    %c0_i32_0 = arith.constant 0 : i32
    return %c0_i32 : i32
  }
  func.func @transform_1(%arg0: i32) -> (i32, i32) {
    %c0_i32 = arith.constant 0 : i32
    %c0_i32_0 = arith.constant 0 : i32
    %c0_i32_1 = arith.constant 0 : i32
    return %c0_i32, %c0_i32_0 : i32, i32
  }
  func.func @transform_2(%arg0: i32) -> (i32, i32) {
    %c0_i32 = arith.constant 0 : i32
    %c0_i32_0 = arith.constant 0 : i32
    %c0_i32_1 = arith.constant 0 : i32
    return %c0_i32, %c0_i32_0 : i32, i32
  }
  func.func @transform_3(%arg0: i32) -> (i32, i32) {
    %c0_i32 = arith.constant 0 : i32
    %c0_i32_0 = arith.constant 0 : i32
    %c0_i32_1 = arith.constant 0 : i32
    return %c0_i32, %c0_i32_0 : i32, i32
  }
  func.func @transform_4(%arg0: i32) -> (i32, i32) {
    %c0_i32 = arith.constant 0 : i32
    %c0_i32_0 = arith.constant 0 : i32
    %c0_i32_1 = arith.constant 0 : i32
    return %c0_i32, %c0_i32_0 : i32, i32
  }
  func.func @transform_5(%arg0: i32) -> (i32, i32) {
    %c0_i32 = arith.constant 0 : i32
    %c0_i32_0 = arith.constant 0 : i32
    %c0_i32_1 = arith.constant 0 : i32
    return %c0_i32, %c0_i32_0 : i32, i32
  }
  func.func @transform_6(%arg0: i32) -> (i32, i32) {
    %c0_i32 = arith.constant 0 : i32
    %c0_i32_0 = arith.constant 0 : i32
    %c0_i32_1 = arith.constant 0 : i32
    return %c0_i32, %c0_i32_0 : i32, i32
  }
}

</mosaic_0001>

<bundles_post_ra>
// kernel: tpu_custom_call.1
= control target key start
LH: loop header
LB: loop body
LE: loop exit
PB: predicated region body
PF: predicated region fallthrough
CT: control target
= control target key end

     0   :  { %s2300_s0 = inlined_call_operand.vmem [shape: f32[8], index: 0, kind: input, shape index: {}]   ;;  %s2301_s1 = inlined_call_operand.hbm [shape: f32[1,512], index: 1, kind: input, shape index: {}]   ;;  %s2302_s2 = inlined_call_operand.hbm [shape: bf16[128,512], index: 2, kind: input, shape index: {}]   ;;  %s2303_s3 = inlined_call_operand.vmem [shape: f32[1,512], index: 3, kind: input, shape index: {}]   ;;  %s2304_s4 = inlined_call_operand.vmem [shape: f32[1,128], index: 4, kind: input, shape index: {}]   ;;  %s2305_s5 = inlined_call_operand.<no memory space> [shape: f32[1,1], index: 5, kind: input, shape index: {}]   ;;  %s2306_s6 = inlined_call_operand.hbm [shape: f32[1,1], index: 6, kind: output, shape index: {}]  }
   0x1   :  { %v11_v0 = vstv %s2305_s5 }
   0x2   :  { %12 = vst [vmem:[#allocation2] sm:$0x1] %v11_v0 }
   0x3   :  { %13 = vsyncpa [#allocation6], 0 }
   0x4   :  { %14 = vsyncpa [#allocation4], 0 }
   0x5   :  { %15 = vsyncpa [#allocation9], 0 }
   0x6   :  { %16 = vsyncpa [#allocation5], 0  ;;  %s23_s25 = sshll.u32 %s2300_s0, 4  ;;  %s24_s25 = int_to_ptr.vmem [resolvable:$true] %s23_s25 }
   0x7   :  { %s1751_s26 = scalar_lea.vmem %s24_s25, 16  ;;  %p1756_p1 = scmp.lt.s32.totalorder %s24_s25, %s24_s25 }
   0x8   :  { %p1752_p0 = scmp.ne.s32.totalorder %s24_s25, %s1751_s26  ;;  %p1757_p2 = scmp.lt.s32.totalorder %s1751_s26, %s1751_s26 }
   0xa   :  { %p1758_p3 = por %p1757_p2, %p1756_p1 }
   0xc   :  { %p1759_p4 = pnand %p1758_p3, %p1752_p0 }
   0xe   :  { %1762 = shalt.err (!%p1759_p4)
}
   0xf   :  { %s1831_s27 = smov [#allocation3]   ;;  %s1832_s5 = smov [#allocation7]  }
  0x10   :  { %26 = dma.vmem_to_smem %s24_s25, 16, %s1831_s27, [#allocation6]  }
  0x11   :  { %s33_s28 = sshll.u32 %s1832_s5, 4  ;;  %s1833_s29 = smov [#allocation8]   ;;  %s34_s28 = int_to_ptr.vmem [resolvable:$true] %s33_s28 }
  0x12   :  { %s42_s30 = sshll.u32 %s1833_s29, 4  ;;  %s1771_s7 = scalar_lea.vmem %s34_s28, 64  ;;  %s43_s30 = int_to_ptr.vmem [resolvable:$true] %s42_s30 }
  0x13   :  { %p1772_p5 = scmp.ne.s32.totalorder %s34_s28, %s1771_s7  ;;  %p1776_p6 = scmp.lt.s32.totalorder %s34_s28, %s34_s28 }
  0x14   :  { %p1777_p7 = scmp.lt.s32.totalorder %s1771_s7, %s1771_s7 }
  0x16   :  { %p1778_p8 = por %p1777_p7, %p1776_p6 }
  0x18   :  { %p1779_p9 = pnand %p1778_p8, %p1772_p5 }
  0x1a   :  { %1782 = shalt.err (!%p1779_p9)
}
  0x1b   :  { %36 = dma.hbm_to_vmem [thread:$0]  %s2301_s1, 64, %s34_s28, [#allocation4]  }
  0x1c   :  { %s1791_s9 = scalar_lea.vmem %s43_s30, 4096  ;;  %p1796_p11 = scmp.lt.s32.totalorder %s43_s30, %s43_s30 }
  0x1d   :  { %p1792_p10 = scmp.ne.s32.totalorder %s43_s30, %s1791_s9  ;;  %p1797_p12 = scmp.lt.s32.totalorder %s1791_s9, %s1791_s9 }
  0x1f   :  { %p1798_p13 = por %p1797_p12, %p1796_p11 }
  0x21   :  { %p1799_p0 = pnand %p1798_p13, %p1792_p10 }
  0x23   :  { %1802 = shalt.err (!%p1799_p0)
}
  0x24   :  { %s1834_s10 = smov 256   ;;  %s1835_s11 = smov 16  }
  0x25   :  { %48 = dma.hbm_to_vmem [thread:$0]  %s2302_s2, 4096, %s43_s30, [#allocation9], %s1834_s10, %s1834_s10, %s1835_s11  }
  0x26   :  { %1823 = dma.done.wait [#allocation6], 16  }
  0x27   :  { %1824 = vsyncadd [#allocation6], 4294967280 }
  0x28   :  { %1825 = dma.done.wait [#allocation4], 64  }
  0x29   :  { %1826 = vsyncadd [#allocation4], 4294967232 }
  0x2a   :  { %1827 = dma.done.wait [#allocation9], 4096  }
  0x2b   :  { %1828 = vsyncadd [#allocation9], 4294963200 }
  0x2c   :  { %64 = sfence }
  0x2d   :  { %v1886_v1 = vld [vmem:[#allocation8 + $0xe4] ss:$16 sps:$4 sm:$0xff]   ;;  %v1888_v2 = vld [vmem:[#allocation8 + $0xec] ss:$16 sps:$4 sm:$0xff]   ;;  %v1836_v3 = vmov 0   ;;  %s68_s1 = sld [smem:[#allocation3]]  ;;  %v355_v36 = vlaneseq }
  0x2e   :  { %296 = vmatprep.mubr.bf16.mxu0 %v1836_v3  ;;  %337 = vmatprep.mubr.bf16.mxu1 %v1836_v3  ;;  %v1893_v4 = vld [vmem:[#allocation8 + $0xe0] ss:$16 sps:$4 sm:$0xff]   ;;  %v1895_v5 = vld [vmem:[#allocation8 + $0xe8] ss:$16 sps:$4 sm:$0xff]   ;;  %v1898_v6 = vld [vmem:[#allocation8 + $0xc4] ss:$16 sps:$4 sm:$0xff]  }
  0x2f   :  { %264 = vmatprep.subr.bf16.mxu0 %v1886_v1  ;;  %305 = vmatprep.subr.bf16.mxu1 %v1888_v2  ;;  %v1902_v7 = vld [vmem:[#allocation8 + $0xcc] ss:$16 sps:$4 sm:$0xff]   ;;  %v1904_v8 = vld [vmem:[#allocation8 + $0xc0] ss:$16 sps:$4 sm:$0xff]   ;;  %v1907_v9 = vld [vmem:[#allocation8 + $0xc8] ss:$16 sps:$4 sm:$0xff]  }
  0x30   :  { %265 = vmatpush1.bf16.msra.mxu0 %v1893_v4  ;;  %306 = vmatpush1.bf16.msra.mxu1 %v1895_v5  ;;  %v1910_v10 = vld [vmem:[#allocation8 + $0xa4] ss:$16 sps:$4 sm:$0xff]   ;;  %v1912_v11 = vld [vmem:[#allocation8 + $0xac] ss:$16 sps:$4 sm:$0xff]   ;;  %v1914_v12 = vld [vmem:[#allocation8 + $0xa0] ss:$16 sps:$4 sm:$0xff]  }
  0x31   :  { %266 = vmatprep.subr.bf16.mxu0 %v1898_v6  ;;  %307 = vmatprep.subr.bf16.mxu1 %v1902_v7  ;;  %v1916_v13 = vld [vmem:[#allocation8 + $0xa8] ss:$16 sps:$4 sm:$0xff]   ;;  %v1920_v14 = vld [vmem:[#allocation8 + $0x84] ss:$16 sps:$4 sm:$0xff]   ;;  %v1924_v15 = vld [vmem:[#allocation8 + $0x8c] ss:$16 sps:$4 sm:$0xff]  }
  0x32   :  { %v1926_v16 = vld [vmem:[#allocation8 + $0x80] ss:$16 sps:$4 sm:$0xff]   ;;  %v1930_v17 = vld [vmem:[#allocation8 + $0x88] ss:$16 sps:$4 sm:$0xff]   ;;  %v1932_v18 = vld [vmem:[#allocation8 + $0x64] ss:$16 sps:$4 sm:$0xff]  }
  0x33   :  { %v1936_v19 = vld [vmem:[#allocation8 + $0x6c] ss:$16 sps:$4 sm:$0xff]   ;;  %v1938_v20 = vld [vmem:[#allocation8 + $0x60] ss:$16 sps:$4 sm:$0xff]   ;;  %v1940_v21 = vld [vmem:[#allocation8 + $0x68] ss:$16 sps:$4 sm:$0xff]   ;;  %v69_v42 = vstv %s68_s1 }
  0x34   :  { %267 = vmatpush1.bf16.msra.mxu0 %v1904_v8  ;;  %308 = vmatpush1.bf16.msra.mxu1 %v1907_v9  ;;  %v1944_v22 = vld [vmem:[#allocation8 + $0x44] ss:$16 sps:$4 sm:$0xff]   ;;  %v1948_v23 = vld [vmem:[#allocation8 + $0x4c] ss:$16 sps:$4 sm:$0xff]   ;;  %v1952_v24 = vld [vmem:[#allocation8 + $0x40] ss:$16 sps:$4 sm:$0xff]  }
  0x35   :  { %268 = vmatprep.subr.bf16.mxu0 %v1910_v10  ;;  %309 = vmatprep.subr.bf16.mxu1 %v1912_v11  ;;  %v1954_v25 = vld [vmem:[#allocation8 + $0x48] ss:$16 sps:$4 sm:$0xff]   ;;  %v1958_v26 = vld [vmem:[#allocation8 + $0x24] ss:$16 sps:$4 sm:$0xff]   ;;  %v1960_v27 = vld [vmem:[#allocation8 + $0x2c] ss:$16 sps:$4 sm:$0xff]  }
  0x36   :  { %v1964_v28 = vld [vmem:[#allocation8 + $0x20] ss:$16 sps:$4 sm:$0xff]   ;;  %v1966_v29 = vld [vmem:[#allocation8 + $0x28] ss:$16 sps:$4 sm:$0xff]   ;;  %v1970_v30 = vld [vmem:[#allocation8 + $0x4] ss:$16 sps:$4 sm:$0xff]  }
  0x37   :  { %v1972_v31 = vld [vmem:[#allocation8 + $0xc] ss:$16 sps:$4 sm:$0xff]   ;;  %v1976_v32 = vld [vmem:[#allocation8] ss:$16 sps:$4 sm:$0xff]   ;;  %v1978_v33 = vld [vmem:[#allocation8 + $0x8] ss:$16 sps:$4 sm:$0xff]  }
  0x38   :  { %269 = vmatpush1.bf16.msra.mxu0 %v1914_v12  ;;  %310 = vmatpush1.bf16.msra.mxu1 %v1916_v13  ;;  %v1837_v34 = vmov 1966171168   ;;  %v356_v38 = vshrl.u32 %v355_v36, 7  ;;  %v2022_v41 = vld [vmem:[#allocation7] sm:$0xf]  ;;  %s1505_s15 = sld [smem:[#allocation3 + $0x1]] }
  0x39   :  { %270 = vmatprep.subr.bf16.mxu0 %v1920_v14  ;;  %311 = vmatprep.subr.bf16.mxu1 %v1924_v15  ;;  %v353_v35 = vunpack.c.l.s4 %v1837_v34  ;;  %v70_v47 = vmul.f32 %v69_v42, %v2022_v41  ;;  %v2030_v49 = vld [vmem:[%s2303_s3] sm:$0xf]  ;;  %s1509_s16 = sld [smem:[#allocation3 + $0x2]]  ;;  %vm1445_vm0 = vcmask 1040384   ;;  %s1838_s25 = smov [#allocation10]   ;;  %vm1451_vm1 = vcmask 0  }
  0x3a   :  { %s1513_s17 = sld [smem:[#allocation3 + $0x3]]  ;;  %s1459_s26 = sshll.u32 %s1838_s25, 4  ;;  %s1460_s26 = int_to_ptr.vmem [resolvable:$true] %s1459_s26 }
  0x3b   :  { %v354_v37 = vunpack.c.0.s8 %v353_v35  ;;  %v71_v56 = vadd.f32 %v70_v47, %v2030_v49  ;;  %s1517_s18 = sld [smem:[#allocation3 + $0x4]]  ;;  %s1803_s27 = scalar_lea.vmem %s1460_s26, 16 }
  0x3c   :  { %271 = vmatpush1.bf16.msra.mxu0 %v1926_v16  ;;  %312 = vmatpush1.bf16.msra.mxu1 %v1930_v17  ;;  %s1521_s19 = sld [smem:[#allocation3 + $0x5]]  ;;  %p1804_p1 = scmp.ne.s32.totalorder %s1460_s26, %s1803_s27 }
  0x3d   :  { %272 = vmatprep.subr.bf16.mxu0 %v1932_v18  ;;  %313 = vmatprep.subr.bf16.mxu1 %v1936_v19  ;;  %v2024_v43 = vsub.s32 %v354_v37, %v356_v38  ;;  %s1525_s20 = sld [smem:[#allocation3 + $0x6]]  ;;  %s1807_s5 = scalar_lea.vmem %s1460_s26, 32 }
  0x3e   :  { %p1808_p2 = scmp.lt.s32.totalorder %s1460_s26, %s1460_s26  ;;  %p1809_p3 = scmp.lt.s32.totalorder %s1807_s5, %s1803_s27 }
  0x40   :  { %273 = vmatpush1.bf16.msra.mxu0 %v1938_v20  ;;  %314 = vmatpush1.bf16.msra.mxu1 %v1940_v21  ;;  %p1810_p4 = por %p1809_p3, %p1808_p2 }
  0x41   :  { %274 = vmatprep.subr.bf16.mxu0 %v1944_v22  ;;  %315 = vmatprep.subr.bf16.mxu1 %v1948_v23 }
  0x42   :  { %p1811_p5 = pnand %p1810_p4, %p1804_p1 }
  0x44   :  { %275 = vmatpush1.bf16.msra.mxu0 %v1952_v24  ;;  %316 = vmatpush1.bf16.msra.mxu1 %v1954_v25 }
  0x45   :  { %276 = vmatprep.subr.bf16.mxu0 %v1958_v26  ;;  %317 = vmatprep.subr.bf16.mxu1 %v1960_v27 }
  0x48   :  { %277 = vmatpush1.bf16.msra.mxu0 %v1964_v28  ;;  %318 = vmatpush1.bf16.msra.mxu1 %v1966_v29 }
  0x49   :  { %278 = vmatprep.subr.bf16.mxu0 %v1970_v30  ;;  %319 = vmatprep.subr.bf16.mxu1 %v1972_v31 }
  0x4c   :  { %279 = vmatpush1.bf16.msra.mxu0 %v1976_v32  ;;  %320 = vmatpush1.bf16.msra.mxu1 %v1978_v33 }
  0x4d   :  { %412 = vmatprep.subr.bf16.mxu0 %v1886_v1  ;;  %453 = vmatprep.subr.bf16.mxu1 %v1888_v2 }
  0x4f   :  { %297 = vmatmul.mubr.bf16.vlgmr.msra.gmra.mxu0 %v1836_v3  ;;  %338 = vmatmul.mubr.bf16.vlgmr.msra.gmra.mxu1 %v1836_v3 }
  0x50   :  { %413 = vmatpush1.bf16.msra.mxu0 %v1893_v4  ;;  %454 = vmatpush1.bf16.msra.mxu1 %v1895_v5 }
  0x51   :  { %414 = vmatprep.subr.bf16.mxu0 %v1898_v6  ;;  %455 = vmatprep.subr.bf16.mxu1 %v1902_v7 }
  0x52   :  { %444 = vmatprep.mubr.bf16.mxu0 %v1836_v3  ;;  %485 = vmatprep.mubr.bf16.mxu1 %v1836_v3 }
  0x54   :  { %415 = vmatpush1.bf16.msra.mxu0 %v1904_v8  ;;  %456 = vmatpush1.bf16.msra.mxu1 %v1907_v9 }
  0x55   :  { %416 = vmatprep.subr.bf16.mxu0 %v1910_v10  ;;  %457 = vmatprep.subr.bf16.mxu1 %v1912_v11 }
  0x58   :  { %417 = vmatpush1.bf16.msra.mxu0 %v1914_v12  ;;  %458 = vmatpush1.bf16.msra.mxu1 %v1916_v13 }
  0x59   :  { %418 = vmatprep.subr.bf16.mxu0 %v1920_v14  ;;  %459 = vmatprep.subr.bf16.mxu1 %v1924_v15 }
  0x5c   :  { %419 = vmatpush1.bf16.msra.mxu0 %v1926_v16  ;;  %460 = vmatpush1.bf16.msra.mxu1 %v1930_v17 }
  0x5d   :  { %420 = vmatprep.subr.bf16.mxu0 %v1932_v18  ;;  %461 = vmatprep.subr.bf16.mxu1 %v1936_v19 }
  0x60   :  { %421 = vmatpush1.bf16.msra.mxu0 %v1938_v20  ;;  %462 = vmatpush1.bf16.msra.mxu1 %v1940_v21 }
  0x61   :  { %422 = vmatprep.subr.bf16.mxu0 %v1944_v22  ;;  %463 = vmatprep.subr.bf16.mxu1 %v1948_v23 }
  0x64   :  { %423 = vmatpush1.bf16.msra.mxu0 %v1952_v24  ;;  %464 = vmatpush1.bf16.msra.mxu1 %v1954_v25 }
  0x65   :  { %424 = vmatprep.subr.bf16.mxu0 %v1958_v26  ;;  %465 = vmatprep.subr.bf16.mxu1 %v1960_v27 }
  0x68   :  { %425 = vmatpush1.bf16.msra.mxu0 %v1964_v28  ;;  %466 = vmatpush1.bf16.msra.mxu1 %v1966_v29 }
  0x69   :  { %426 = vmatprep.subr.bf16.mxu0 %v1970_v30  ;;  %467 = vmatprep.subr.bf16.mxu1 %v1972_v31 }
  0x6c   :  { %427 = vmatpush1.bf16.msra.mxu0 %v1976_v32  ;;  %468 = vmatpush1.bf16.msra.mxu1 %v1978_v33 }
  0x6d   :  { %560 = vmatprep.subr.bf16.mxu0 %v1886_v1  ;;  %601 = vmatprep.subr.bf16.mxu1 %v1888_v2 }
 0x10f   :  { %v298_v39 = vpop.f32.mrf.mxu0  ;;  %v339_v40 = vpop.f32.mrf.mxu1 }
 0x111   :  { %v300_v44 = vpop.f32.mrf.mxu0  ;;  %v341_v45 = vpop.f32.mrf.mxu1 }
 0x112   :  { %v350_v46 = vcombine.low %v298_v39, %v300_v44  ;;  %v351_v48 = vcombine.low %v339_v40, %v341_v45 }
 0x113   :  { %v302_v50 = vpop.f32.mrf.mxu0  ;;  %v343_v51 = vpop.f32.mrf.mxu1 }
 0x114   :  { %v358_v52 = vrot.slane %v350_v46, %v2024_v43  ;;  %v365_v53 = vrot.slane %v351_v48, %v2024_v43 }
 0x115   :  { %v303_v54 = vpop.f32.mrf.mxu0  ;;  %v344_v55 = vpop.f32.mrf.mxu1 }
 0x116   :  { %v366_v57 = vcombine.low %v358_v52, %v365_v53 }
 0x118   :  { %v373_v58 = vrot.slane %v366_v57, %v2024_v43 }
 0x11a   :  { %v375_v59 = vadd.f32 %v373_v58, %v71_v56  ;;  %v408_v56 = vstv %s1505_s15 }
 0x11c   :  { %v1502_v60 = vmul.f32 -1.442695, %v375_v59  ;;  %v383_v61 = vrot.slane %v375_v59, 1  ;;  %v394_v63 = vrot.slane %v375_v59, 3  ;;  %v391_v35 = vrot.slane %v375_v59, 2 }
 0x11e   :  { %1589 = vpow2.f32 %v1502_v60  ;;  %v1503_v62 = vmul.f32 -1.442695, %v383_v61  ;;  %v1504_v0 = vmul.f32 -1.442695, %v394_v63  ;;  %v409_v60 = vmul.f32 %v408_v56, %v2022_v41 }
 0x120   :  { %1591 = vpow2.f32 %v1503_v62 }
 0x121   :  { %1593 = vpow2.f32 %v1504_v0 }
 0x12b   :  { %v1590_v34 = vpop.eup %1589 }
 0x12c   :  { %v379_v36 = vadd.f32 1.0, %v1590_v34 }
 0x12d   :  { %v1592_v37 = vpop.eup %1591 }
 0x12e   :  { %1595 = vrcp.f32 %v379_v36  ;;  %v388_v38 = vadd.f32 1.0, %v1592_v37  ;;  %v1594_v39 = vpop.eup %1593  ;;  %v410_v37 = vadd.f32 %v409_v60, %v2030_v49 }
 0x12f   :  { %1597 = vtanh.f32 %v391_v35  ;;  %v399_v45 = vadd.f32 1.0, %v1594_v39 }
 0x130   :  { %1599 = vrcp.f32 %v388_v38 }
 0x131   :  { %1601 = vrcp.f32 %v399_v45 }
 0x13b   :  { %v1596_v40 = vpop.eup %1595 }
 0x13c   :  { %v1598_v42 = vpop.eup %1597 }
 0x13d   :  { %v1600_v44 = vpop.eup %1599  ;;  %v403_v47 = vmul.f32 %v1598_v42, %v1596_v40 }
 0x13e   :  { %v402_v46 = vmul.f32 0.0, %v1600_v44  ;;  %v1602_v50 = vpop.eup %1601 }
 0x140   :  { %v2036_v48 = vadd.f32 %v403_v47, %v402_v46 }
 0x142   :  { %1603 = vtanh.f32 %v2036_v48 }
 0x14f   :  { %v1604_v51 = vpop.eup %1603 }
 0x150   :  { %v406_v52 = vmul.f32 %v1604_v51, %v1602_v50 }
 0x152   :  { %v411_v53 = vpack.c.bf16 %v406_v52, %v406_v52 }
 0x154   :  { %445 = vmatmul.mubr.bf16.vlgmr.msra.gmra.mxu0 %v411_v53  ;;  %486 = vmatmul.mubr.bf16.vlgmr.msra.gmra.mxu1 %v411_v53 }
 0x155   :  { %561 = vmatpush1.bf16.msra.mxu0 %v1893_v4  ;;  %602 = vmatpush1.bf16.msra.mxu1 %v1895_v5 }
 0x156   :  { %562 = vmatprep.subr.bf16.mxu0 %v1898_v6  ;;  %603 = vmatprep.subr.bf16.mxu1 %v1902_v7 }
 0x157   :  { %592 = vmatprep.mubr.bf16.mxu0 %v1836_v3  ;;  %633 = vmatprep.mubr.bf16.mxu1 %v1836_v3 }
 0x159   :  { %563 = vmatpush1.bf16.msra.mxu0 %v1904_v8  ;;  %604 = vmatpush1.bf16.msra.mxu1 %v1907_v9 }
 0x15a   :  { %564 = vmatprep.subr.bf16.mxu0 %v1910_v10  ;;  %605 = vmatprep.subr.bf16.mxu1 %v1912_v11 }
 0x15d   :  { %565 = vmatpush1.bf16.msra.mxu0 %v1914_v12  ;;  %606 = vmatpush1.bf16.msra.mxu1 %v1916_v13 }
 0x15e   :  { %566 = vmatprep.subr.bf16.mxu0 %v1920_v14  ;;  %607 = vmatprep.subr.bf16.mxu1 %v1924_v15 }
 0x161   :  { %567 = vmatpush1.bf16.msra.mxu0 %v1926_v16  ;;  %608 = vmatpush1.bf16.msra.mxu1 %v1930_v17 }
 0x162   :  { %568 = vmatprep.subr.bf16.mxu0 %v1932_v18  ;;  %609 = vmatprep.subr.bf16.mxu1 %v1936_v19 }
 0x165   :  { %569 = vmatpush1.bf16.msra.mxu0 %v1938_v20  ;;  %610 = vmatpush1.bf16.msra.mxu1 %v1940_v21 }
 0x166   :  { %570 = vmatprep.subr.bf16.mxu0 %v1944_v22  ;;  %611 = vmatprep.subr.bf16.mxu1 %v1948_v23 }
 0x169   :  { %571 = vmatpush1.bf16.msra.mxu0 %v1952_v24  ;;  %612 = vmatpush1.bf16.msra.mxu1 %v1954_v25 }
 0x16a   :  { %572 = vmatprep.subr.bf16.mxu0 %v1958_v26  ;;  %613 = vmatprep.subr.bf16.mxu1 %v1960_v27 }
 0x16d   :  { %573 = vmatpush1.bf16.msra.mxu0 %v1964_v28  ;;  %614 = vmatpush1.bf16.msra.mxu1 %v1966_v29 }
 0x16e   :  { %574 = vmatprep.subr.bf16.mxu0 %v1970_v30  ;;  %615 = vmatprep.subr.bf16.mxu1 %v1972_v31 }
 0x171   :  { %575 = vmatpush1.bf16.msra.mxu0 %v1976_v32  ;;  %616 = vmatpush1.bf16.msra.mxu1 %v1978_v33 }
 0x172   :  { %708 = vmatprep.subr.bf16.mxu0 %v1886_v1  ;;  %749 = vmatprep.subr.bf16.mxu1 %v1888_v2 }
 0x214   :  { %v446_v54 = vpop.f32.mrf.mxu0  ;;  %v487_v55 = vpop.f32.mrf.mxu1 }
 0x216   :  { %v448_v57 = vpop.f32.mrf.mxu0  ;;  %v489_v58 = vpop.f32.mrf.mxu1 }
 0x217   :  { %v498_v59 = vcombine.low %v446_v54, %v448_v57  ;;  %v499_v61 = vcombine.low %v487_v55, %v489_v58 }
 0x218   :  { %v450_v62 = vpop.f32.mrf.mxu0  ;;  %v491_v63 = vpop.f32.mrf.mxu1 }
 0x219   :  { %v506_v0 = vrot.slane %v498_v59, %v2024_v43  ;;  %v513_v34 = vrot.slane %v499_v61, %v2024_v43 }
 0x21a   :  { %v451_v35 = vpop.f32.mrf.mxu0  ;;  %v492_v36 = vpop.f32.mrf.mxu1 }
 0x21b   :  { %v514_v38 = vcombine.low %v506_v0, %v513_v34 }
 0x21d   :  { %v521_v39 = vrot.slane %v514_v38, %v2024_v43 }
 0x21f   :  { %v523_v40 = vadd.f32 %v521_v39, %v410_v37  ;;  %v556_v37 = vstv %s1509_s16 }
 0x221   :  { %v1506_v42 = vmul.f32 -1.442695, %v523_v40  ;;  %v531_v44 = vrot.slane %v523_v40, 1  ;;  %v542_v46 = vrot.slane %v523_v40, 3  ;;  %v539_v51 = vrot.slane %v523_v40, 2 }
 0x223   :  { %1605 = vpow2.f32 %v1506_v42  ;;  %v1507_v45 = vmul.f32 -1.442695, %v531_v44  ;;  %v1508_v47 = vmul.f32 -1.442695, %v542_v46  ;;  %v557_v42 = vmul.f32 %v556_v37, %v2022_v41 }
 0x225   :  { %1607 = vpow2.f32 %v1507_v45 }
 0x226   :  { %1609 = vpow2.f32 %v1508_v47 }
 0x230   :  { %v1606_v50 = vpop.eup %1605 }
 0x231   :  { %v527_v52 = vadd.f32 1.0, %v1606_v50 }
 0x232   :  { %v1608_v53 = vpop.eup %1607 }
 0x233   :  { %1611 = vrcp.f32 %v527_v52  ;;  %v536_v54 = vadd.f32 1.0, %v1608_v53  ;;  %v1610_v55 = vpop.eup %1609  ;;  %v558_v53 = vadd.f32 %v557_v42, %v2030_v49 }
 0x234   :  { %1613 = vtanh.f32 %v539_v51  ;;  %v547_v59 = vadd.f32 1.0, %v1610_v55 }
 0x235   :  { %1615 = vrcp.f32 %v536_v54 }
 0x236   :  { %1617 = vrcp.f32 %v547_v59 }
 0x240   :  { %v1612_v56 = vpop.eup %1611 }
 0x241   :  { %v1614_v57 = vpop.eup %1613 }
 0x242   :  { %v1616_v58 = vpop.eup %1615  ;;  %v551_v61 = vmul.f32 %v1614_v57, %v1612_v56 }
 0x243   :  { %v550_v60 = vmul.f32 %v1616_v58, %v2036_v48  ;;  %v1618_v63 = vpop.eup %1617 }
 0x245   :  { %v2079_v62 = vadd.f32 %v551_v61, %v550_v60 }
 0x247   :  { %1619 = vtanh.f32 %v2079_v62 }
 0x254   :  { %v1620_v0 = vpop.eup %1619 }
 0x255   :  { %v554_v34 = vmul.f32 %v1620_v0, %v1618_v63 }
 0x257   :  { %v559_v35 = vpack.c.bf16 %v554_v34, %v554_v34 }
 0x259   :  { %593 = vmatmul.mubr.bf16.vlgmr.msra.gmra.mxu0 %v559_v35  ;;  %634 = vmatmul.mubr.bf16.vlgmr.msra.gmra.mxu1 %v559_v35 }
 0x25a   :  { %709 = vmatpush1.bf16.msra.mxu0 %v1893_v4  ;;  %750 = vmatpush1.bf16.msra.mxu1 %v1895_v5 }
 0x25b   :  { %710 = vmatprep.subr.bf16.mxu0 %v1898_v6  ;;  %751 = vmatprep.subr.bf16.mxu1 %v1902_v7 }
 0x25c   :  { %740 = vmatprep.mubr.bf16.mxu0 %v1836_v3  ;;  %781 = vmatprep.mubr.bf16.mxu1 %v1836_v3 }
 0x25e   :  { %711 = vmatpush1.bf16.msra.mxu0 %v1904_v8  ;;  %752 = vmatpush1.bf16.msra.mxu1 %v1907_v9 }
 0x25f   :  { %712 = vmatprep.subr.bf16.mxu0 %v1910_v10  ;;  %753 = vmatprep.subr.bf16.mxu1 %v1912_v11 }
 0x262   :  { %713 = vmatpush1.bf16.msra.mxu0 %v1914_v12  ;;  %754 = vmatpush1.bf16.msra.mxu1 %v1916_v13 }
 0x263   :  { %714 = vmatprep.subr.bf16.mxu0 %v1920_v14  ;;  %755 = vmatprep.subr.bf16.mxu1 %v1924_v15 }
 0x266   :  { %715 = vmatpush1.bf16.msra.mxu0 %v1926_v16  ;;  %756 = vmatpush1.bf16.msra.mxu1 %v1930_v17 }
 0x267   :  { %716 = vmatprep.subr.bf16.mxu0 %v1932_v18  ;;  %757 = vmatprep.subr.bf16.mxu1 %v1936_v19 }
 0x26a   :  { %717 = vmatpush1.bf16.msra.mxu0 %v1938_v20  ;;  %758 = vmatpush1.bf16.msra.mxu1 %v1940_v21 }
 0x26b   :  { %718 = vmatprep.subr.bf16.mxu0 %v1944_v22  ;;  %759 = vmatprep.subr.bf16.mxu1 %v1948_v23 }
 0x26e   :  { %719 = vmatpush1.bf16.msra.mxu0 %v1952_v24  ;;  %760 = vmatpush1.bf16.msra.mxu1 %v1954_v25 }
 0x26f   :  { %720 = vmatprep.subr.bf16.mxu0 %v1958_v26  ;;  %761 = vmatprep.subr.bf16.mxu1 %v1960_v27 }
 0x272   :  { %721 = vmatpush1.bf16.msra.mxu0 %v1964_v28  ;;  %762 = vmatpush1.bf16.msra.mxu1 %v1966_v29 }
 0x273   :  { %722 = vmatprep.subr.bf16.mxu0 %v1970_v30  ;;  %763 = vmatprep.subr.bf16.mxu1 %v1972_v31 }
 0x276   :  { %723 = vmatpush1.bf16.msra.mxu0 %v1976_v32  ;;  %764 = vmatpush1.bf16.msra.mxu1 %v1978_v33 }
 0x277   :  { %856 = vmatprep.subr.bf16.mxu0 %v1886_v1  ;;  %897 = vmatprep.subr.bf16.mxu1 %v1888_v2 }
 0x319   :  { %v594_v48 = vpop.f32.mrf.mxu0  ;;  %v635_v36 = vpop.f32.mrf.mxu1 }
 0x31b   :  { %v596_v38 = vpop.f32.mrf.mxu0  ;;  %v637_v39 = vpop.f32.mrf.mxu1 }
 0x31c   :  { %v646_v40 = vcombine.low %v594_v48, %v596_v38  ;;  %v647_v44 = vcombine.low %v635_v36, %v637_v39 }
 0x31d   :  { %v598_v45 = vpop.f32.mrf.mxu0  ;;  %v639_v46 = vpop.f32.mrf.mxu1 }
 0x31e   :  { %v654_v47 = vrot.slane %v646_v40, %v2024_v43  ;;  %v661_v50 = vrot.slane %v647_v44, %v2024_v43 }
 0x31f   :  { %v599_v51 = vpop.f32.mrf.mxu0  ;;  %v640_v52 = vpop.f32.mrf.mxu1 }
 0x320   :  { %v662_v54 = vcombine.low %v654_v47, %v661_v50 }
 0x322   :  { %v669_v55 = vrot.slane %v662_v54, %v2024_v43 }
 0x324   :  { %v671_v56 = vadd.f32 %v669_v55, %v558_v53  ;;  %v704_v53 = vstv %s1513_s17 }
 0x326   :  { %v1510_v57 = vmul.f32 -1.442695, %v671_v56  ;;  %v679_v58 = vrot.slane %v671_v56, 1  ;;  %v690_v60 = vrot.slane %v671_v56, 3  ;;  %v687_v0 = vrot.slane %v671_v56, 2 }
 0x328   :  { %1621 = vpow2.f32 %v1510_v57  ;;  %v1511_v59 = vmul.f32 -1.442695, %v679_v58  ;;  %v1512_v61 = vmul.f32 -1.442695, %v690_v60  ;;  %v705_v57 = vmul.f32 %v704_v53, %v2022_v41 }
 0x32a   :  { %1623 = vpow2.f32 %v1511_v59 }
 0x32b   :  { %1625 = vpow2.f32 %v1512_v61 }
 0x335   :  { %v1622_v63 = vpop.eup %1621 }
 0x336   :  { %v675_v34 = vadd.f32 1.0, %v1622_v63 }
 0x337   :  { %v1624_v35 = vpop.eup %1623 }
 0x338   :  { %1627 = vrcp.f32 %v675_v34  ;;  %v684_v48 = vadd.f32 1.0, %v1624_v35  ;;  %v1626_v36 = vpop.eup %1625  ;;  %v706_v35 = vadd.f32 %v705_v57, %v2030_v49 }
 0x339   :  { %1629 = vtanh.f32 %v687_v0  ;;  %v695_v40 = vadd.f32 1.0, %v1626_v36 }
 0x33a   :  { %1631 = vrcp.f32 %v684_v48 }
 0x33b   :  { %1633 = vrcp.f32 %v695_v40 }
 0x345   :  { %v1628_v37 = vpop.eup %1627 }
 0x346   :  { %v1630_v38 = vpop.eup %1629 }
 0x347   :  { %v1632_v39 = vpop.eup %1631  ;;  %v699_v44 = vmul.f32 %v1630_v38, %v1628_v37 }
 0x348   :  { %v698_v42 = vmul.f32 %v1632_v39, %v2079_v62  ;;  %v1634_v46 = vpop.eup %1633 }
 0x34a   :  { %v2122_v45 = vadd.f32 %v699_v44, %v698_v42 }
 0x34c   :  { %1635 = vtanh.f32 %v2122_v45 }
 0x359   :  { %v1636_v47 = vpop.eup %1635 }
 0x35a   :  { %v702_v50 = vmul.f32 %v1636_v47, %v1634_v46 }
 0x35c   :  { %v707_v51 = vpack.c.bf16 %v702_v50, %v702_v50 }
 0x35e   :  { %741 = vmatmul.mubr.bf16.vlgmr.msra.gmra.mxu0 %v707_v51  ;;  %782 = vmatmul.mubr.bf16.vlgmr.msra.gmra.mxu1 %v707_v51 }
 0x35f   :  { %857 = vmatpush1.bf16.msra.mxu0 %v1893_v4  ;;  %898 = vmatpush1.bf16.msra.mxu1 %v1895_v5 }
 0x360   :  { %858 = vmatprep.subr.bf16.mxu0 %v1898_v6  ;;  %899 = vmatprep.subr.bf16.mxu1 %v1902_v7 }
 0x361   :  { %888 = vmatprep.mubr.bf16.mxu0 %v1836_v3  ;;  %929 = vmatprep.mubr.bf16.mxu1 %v1836_v3 }
 0x363   :  { %859 = vmatpush1.bf16.msra.mxu0 %v1904_v8  ;;  %900 = vmatpush1.bf16.msra.mxu1 %v1907_v9 }
 0x364   :  { %860 = vmatprep.subr.bf16.mxu0 %v1910_v10  ;;  %901 = vmatprep.subr.bf16.mxu1 %v1912_v11 }
 0x367   :  { %861 = vmatpush1.bf16.msra.mxu0 %v1914_v12  ;;  %902 = vmatpush1.bf16.msra.mxu1 %v1916_v13 }
 0x368   :  { %862 = vmatprep.subr.bf16.mxu0 %v1920_v14  ;;  %903 = vmatprep.subr.bf16.mxu1 %v1924_v15 }
 0x36b   :  { %863 = vmatpush1.bf16.msra.mxu0 %v1926_v16  ;;  %904 = vmatpush1.bf16.msra.mxu1 %v1930_v17 }
 0x36c   :  { %864 = vmatprep.subr.bf16.mxu0 %v1932_v18  ;;  %905 = vmatprep.subr.bf16.mxu1 %v1936_v19 }
 0x36f   :  { %865 = vmatpush1.bf16.msra.mxu0 %v1938_v20  ;;  %906 = vmatpush1.bf16.msra.mxu1 %v1940_v21 }
 0x370   :  { %866 = vmatprep.subr.bf16.mxu0 %v1944_v22  ;;  %907 = vmatprep.subr.bf16.mxu1 %v1948_v23 }
 0x373   :  { %867 = vmatpush1.bf16.msra.mxu0 %v1952_v24  ;;  %908 = vmatpush1.bf16.msra.mxu1 %v1954_v25 }
 0x374   :  { %868 = vmatprep.subr.bf16.mxu0 %v1958_v26  ;;  %909 = vmatprep.subr.bf16.mxu1 %v1960_v27 }
 0x377   :  { %869 = vmatpush1.bf16.msra.mxu0 %v1964_v28  ;;  %910 = vmatpush1.bf16.msra.mxu1 %v1966_v29 }
 0x378   :  { %870 = vmatprep.subr.bf16.mxu0 %v1970_v30  ;;  %911 = vmatprep.subr.bf16.mxu1 %v1972_v31 }
 0x37b   :  { %871 = vmatpush1.bf16.msra.mxu0 %v1976_v32  ;;  %912 = vmatpush1.bf16.msra.mxu1 %v1978_v33 }
 0x37c   :  { %1004 = vmatprep.subr.bf16.mxu0 %v1886_v1  ;;  %1045 = vmatprep.subr.bf16.mxu1 %v1888_v2 }
 0x41e   :  { %v742_v62 = vpop.f32.mrf.mxu0  ;;  %v783_v52 = vpop.f32.mrf.mxu1 }
 0x420   :  { %v744_v54 = vpop.f32.mrf.mxu0  ;;  %v785_v55 = vpop.f32.mrf.mxu1 }
 0x421   :  { %v794_v56 = vcombine.low %v742_v62, %v744_v54  ;;  %v795_v58 = vcombine.low %v783_v52, %v785_v55 }
 0x422   :  { %v746_v59 = vpop.f32.mrf.mxu0  ;;  %v787_v60 = vpop.f32.mrf.mxu1 }
 0x423   :  { %v802_v61 = vrot.slane %v794_v56, %v2024_v43  ;;  %v809_v63 = vrot.slane %v795_v58, %v2024_v43 }
 0x424   :  { %v747_v0 = vpop.f32.mrf.mxu0  ;;  %v788_v34 = vpop.f32.mrf.mxu1 }
 0x425   :  { %v810_v48 = vcombine.low %v802_v61, %v809_v63 }
 0x427   :  { %v817_v36 = vrot.slane %v810_v48, %v2024_v43 }
 0x429   :  { %v819_v37 = vadd.f32 %v817_v36, %v706_v35 }
 0x42b   :  { %v1514_v38 = vmul.f32 -1.442695, %v819_v37  ;;  %v827_v39 = vrot.slane %v819_v37, 1  ;;  %v838_v42 = vrot.slane %v819_v37, 3  ;;  %v835_v47 = vrot.slane %v819_v37, 2 }
 0x42d   :  { %1637 = vpow2.f32 %v1514_v38  ;;  %v1515_v40 = vmul.f32 -1.442695, %v827_v39  ;;  %v1516_v44 = vmul.f32 -1.442695, %v838_v42 }
 0x42f   :  { %1639 = vpow2.f32 %v1515_v40 }
 0x430   :  { %1641 = vpow2.f32 %v1516_v44 }
 0x43a   :  { %v1638_v46 = vpop.eup %1637 }
 0x43b   :  { %v823_v50 = vadd.f32 1.0, %v1638_v46 }
 0x43c   :  { %v1640_v51 = vpop.eup %1639 }
 0x43d   :  { %1643 = vrcp.f32 %v823_v50  ;;  %v832_v62 = vadd.f32 1.0, %v1640_v51  ;;  %v1642_v52 = vpop.eup %1641 }
 0x43e   :  { %1645 = vtanh.f32 %v835_v47  ;;  %v843_v56 = vadd.f32 1.0, %v1642_v52 }
 0x43f   :  { %1647 = vrcp.f32 %v832_v62 }
 0x440   :  { %1649 = vrcp.f32 %v843_v56 }
 0x44a   :  { %v1644_v53 = vpop.eup %1643 }
 0x44b   :  { %v1646_v54 = vpop.eup %1645 }
 0x44c   :  { %v1648_v55 = vpop.eup %1647  ;;  %v847_v58 = vmul.f32 %v1646_v54, %v1644_v53 }
 0x44d   :  { %v846_v57 = vmul.f32 %v1648_v55, %v2122_v45  ;;  %v1650_v60 = vpop.eup %1649 }
 0x44f   :  { %v2165_v59 = vadd.f32 %v847_v58, %v846_v57 }
 0x451   :  { %1651 = vtanh.f32 %v2165_v59 }
 0x45e   :  { %v1652_v61 = vpop.eup %1651 }
 0x45f   :  { %v850_v63 = vmul.f32 %v1652_v61, %v1650_v60 }
 0x461   :  { %v855_v0 = vpack.c.bf16 %v850_v63, %v850_v63 }
 0x463   :  { %889 = vmatmul.mubr.bf16.vlgmr.msra.gmra.mxu0 %v855_v0  ;;  %930 = vmatmul.mubr.bf16.vlgmr.msra.gmra.mxu1 %v855_v0 }
 0x464   :  { %1005 = vmatpush1.bf16.msra.mxu0 %v1893_v4  ;;  %1046 = vmatpush1.bf16.msra.mxu1 %v1895_v5 }
 0x465   :  { %1006 = vmatprep.subr.bf16.mxu0 %v1898_v6  ;;  %1047 = vmatprep.subr.bf16.mxu1 %v1902_v7  ;;  %v852_v6 = vstv %s1517_s18 }
 0x466   :  { %1036 = vmatprep.mubr.bf16.mxu0 %v1836_v3  ;;  %1077 = vmatprep.mubr.bf16.mxu1 %v1836_v3 }
 0x468   :  { %1007 = vmatpush1.bf16.msra.mxu0 %v1904_v8  ;;  %1048 = vmatpush1.bf16.msra.mxu1 %v1907_v9 }
 0x469   :  { %1008 = vmatprep.subr.bf16.mxu0 %v1910_v10  ;;  %1049 = vmatprep.subr.bf16.mxu1 %v1912_v11  ;;  %v853_v10 = vmul.f32 %v852_v6, %v2022_v41  ;;  %v2214_v6 = vld [vmem:[#allocation8 + $0xe8] ss:$16 sps:$4 sm:$0xff]  }
 0x46c   :  { %1009 = vmatpush1.bf16.msra.mxu0 %v1914_v12  ;;  %1050 = vmatpush1.bf16.msra.mxu1 %v1916_v13 }
 0x46d   :  { %1010 = vmatprep.subr.bf16.mxu0 %v1920_v14  ;;  %1051 = vmatprep.subr.bf16.mxu1 %v1924_v15 }
 0x470   :  { %1011 = vmatpush1.bf16.msra.mxu0 %v1926_v16  ;;  %1052 = vmatpush1.bf16.msra.mxu1 %v1930_v17 }
 0x471   :  { %1012 = vmatprep.subr.bf16.mxu0 %v1932_v18  ;;  %1053 = vmatprep.subr.bf16.mxu1 %v1936_v19 }
 0x474   :  { %1013 = vmatpush1.bf16.msra.mxu0 %v1938_v20  ;;  %1054 = vmatpush1.bf16.msra.mxu1 %v1940_v21 }
 0x475   :  { %1014 = vmatprep.subr.bf16.mxu0 %v1944_v22  ;;  %1055 = vmatprep.subr.bf16.mxu1 %v1948_v23 }
 0x478   :  { %1015 = vmatpush1.bf16.msra.mxu0 %v1952_v24  ;;  %1056 = vmatpush1.bf16.msra.mxu1 %v1954_v25 }
 0x479   :  { %1016 = vmatprep.subr.bf16.mxu0 %v1958_v26  ;;  %1057 = vmatprep.subr.bf16.mxu1 %v1960_v27 }
 0x47c   :  { %1017 = vmatpush1.bf16.msra.mxu0 %v1964_v28  ;;  %1058 = vmatpush1.bf16.msra.mxu1 %v1966_v29 }
 0x47d   :  { %1018 = vmatprep.subr.bf16.mxu0 %v1970_v30  ;;  %1059 = vmatprep.subr.bf16.mxu1 %v1972_v31 }
 0x480   :  { %1019 = vmatpush1.bf16.msra.mxu0 %v1976_v32  ;;  %1060 = vmatpush1.bf16.msra.mxu1 %v1978_v33 }
 0x481   :  { %1152 = vmatprep.subr.bf16.mxu0 %v1886_v1  ;;  %1193 = vmatprep.subr.bf16.mxu1 %v1888_v2  ;;  %v854_v2 = vadd.f32 %v853_v10, %v2030_v49  ;;  %v2231_v10 = vld [vmem:[#allocation8 + $0xa4] ss:$16 sps:$4 sm:$0xff]  }
 0x523   :  { %v890_v4 = vpop.f32.mrf.mxu0  ;;  %v931_v5 = vpop.f32.mrf.mxu1 }
 0x525   :  { %v892_v7 = vpop.f32.mrf.mxu0  ;;  %v933_v8 = vpop.f32.mrf.mxu1 }
 0x526   :  { %v942_v9 = vcombine.low %v890_v4, %v892_v7  ;;  %v943_v11 = vcombine.low %v931_v5, %v933_v8  ;;  %v2211_v5 = vld [vmem:[#allocation8 + $0xe0] ss:$16 sps:$4 sm:$0xff]   ;;  %v2220_v7 = vld [vmem:[#allocation8 + $0xcc] ss:$16 sps:$4 sm:$0xff]  }
 0x527   :  { %v894_v12 = vpop.f32.mrf.mxu0  ;;  %v935_v13 = vpop.f32.mrf.mxu1  ;;  %v2225_v8 = vld [vmem:[#allocation8 + $0xc0] ss:$16 sps:$4 sm:$0xff]  }
 0x528   :  { %v950_v45 = vrot.slane %v942_v9, %v2024_v43  ;;  %v957_v34 = vrot.slane %v943_v11, %v2024_v43  ;;  %v2228_v9 = vld [vmem:[#allocation8 + $0xc8] ss:$16 sps:$4 sm:$0xff]   ;;  %v2234_v11 = vld [vmem:[#allocation8 + $0xac] ss:$16 sps:$4 sm:$0xff]   ;;  %v2237_v12 = vld [vmem:[#allocation8 + $0xa0] ss:$16 sps:$4 sm:$0xff]  }
 0x529   :  { %v895_v35 = vpop.f32.mrf.mxu0  ;;  %v936_v1 = vpop.f32.mrf.mxu1  ;;  %v2240_v13 = vld [vmem:[#allocation8 + $0xa8] ss:$16 sps:$4 sm:$0xff]  }
 0x52a   :  { %v958_v48 = vcombine.low %v950_v45, %v957_v34 }
 0x52c   :  { %v965_v36 = vrot.slane %v958_v48, %v2024_v43 }
 0x52e   :  { %v967_v37 = vadd.f32 %v965_v36, %v854_v2 }
 0x530   :  { %v1518_v38 = vmul.f32 -1.442695, %v967_v37  ;;  %v975_v39 = vrot.slane %v967_v37, 1  ;;  %v986_v42 = vrot.slane %v967_v37, 3  ;;  %v983_v47 = vrot.slane %v967_v37, 2 }
 0x532   :  { %1653 = vpow2.f32 %v1518_v38  ;;  %v1519_v40 = vmul.f32 -1.442695, %v975_v39  ;;  %v1520_v44 = vmul.f32 -1.442695, %v986_v42 }
 0x534   :  { %1655 = vpow2.f32 %v1519_v40 }
 0x535   :  { %1657 = vpow2.f32 %v1520_v44 }
 0x53f   :  { %v1654_v46 = vpop.eup %1653 }
 0x540   :  { %v971_v50 = vadd.f32 1.0, %v1654_v46 }
 0x541   :  { %v1656_v51 = vpop.eup %1655 }
 0x542   :  { %1659 = vrcp.f32 %v971_v50  ;;  %v980_v62 = vadd.f32 1.0, %v1656_v51  ;;  %v1658_v52 = vpop.eup %1657 }
 0x543   :  { %1661 = vtanh.f32 %v983_v47  ;;  %v991_v56 = vadd.f32 1.0, %v1658_v52 }
 0x544   :  { %1663 = vrcp.f32 %v980_v62 }
 0x545   :  { %1665 = vrcp.f32 %v991_v56  ;;  %v1731_v56 = vld [vmem:[#allocation8 + $0x80] ss:$16 sps:$4 sm:$0xff]  }
 0x54f   :  { %v1660_v53 = vpop.eup %1659 }
 0x550   :  { %v1662_v54 = vpop.eup %1661 }
 0x551   :  { %v1664_v55 = vpop.eup %1663  ;;  %v995_v58 = vmul.f32 %v1662_v54, %v1660_v53  ;;  %v1729_v54 = vld [vmem:[#allocation8 + $0x84] ss:$16 sps:$4 sm:$0xff]  }
 0x552   :  { %v994_v57 = vmul.f32 %v1664_v55, %v2165_v59  ;;  %v1666_v61 = vpop.eup %1665  ;;  %v2217_v59 = vld [vmem:[#allocation8 + $0xc4] ss:$16 sps:$4 sm:$0xff]   ;;  %v1730_v55 = vld [vmem:[#allocation8 + $0x8c] ss:$16 sps:$4 sm:$0xff]  }
 0x554   :  { %v2208_v60 = vadd.f32 %v995_v58, %v994_v57  ;;  %v1732_v57 = vld [vmem:[#allocation8 + $0x88] ss:$16 sps:$4 sm:$0xff]   ;;  %v1734_v58 = vld [vmem:[#allocation8 + $0x6c] ss:$16 sps:$4 sm:$0xff]  }
 0x556   :  { %1667 = vtanh.f32 %v2208_v60 }
 0x563   :  { %v1668_v63 = vpop.eup %1667 }
 0x564   :  { %v998_v0 = vmul.f32 %v1668_v63, %v1666_v61  ;;  %v1736_v61 = vld [vmem:[#allocation8 + $0x68] ss:$16 sps:$4 sm:$0xff]   ;;  %v1737_v63 = vld [vmem:[#allocation8 + $0x44] ss:$16 sps:$4 sm:$0xff]  }
 0x566   :  { %v1003_v4 = vpack.c.bf16 %v998_v0, %v998_v0  ;;  %v1738_v0 = vld [vmem:[#allocation8 + $0x4c] ss:$16 sps:$4 sm:$0xff]  }
 0x568   :  { %1037 = vmatmul.mubr.bf16.vlgmr.msra.gmra.mxu0 %v1003_v4  ;;  %1078 = vmatmul.mubr.bf16.vlgmr.msra.gmra.mxu1 %v1003_v4  ;;  %v1739_v4 = vld [vmem:[#allocation8 + $0x40] ss:$16 sps:$4 sm:$0xff]  }
 0x569   :  { %1153 = vmatpush1.bf16.msra.mxu0 %v2211_v5  ;;  %1194 = vmatpush1.bf16.msra.mxu1 %v2214_v6 }
 0x56a   :  { %1154 = vmatprep.subr.bf16.mxu0 %v2217_v59  ;;  %1195 = vmatprep.subr.bf16.mxu1 %v2220_v7 }
 0x56b   :  { %1184 = vmatprep.mubr.bf16.mxu0 %v1836_v3  ;;  %1225 = vmatprep.mubr.bf16.mxu1 %v1836_v3 }
 0x56d   :  { %1155 = vmatpush1.bf16.msra.mxu0 %v2225_v8  ;;  %1196 = vmatpush1.bf16.msra.mxu1 %v2228_v9 }
 0x56e   :  { %1156 = vmatprep.subr.bf16.mxu0 %v2231_v10  ;;  %1197 = vmatprep.subr.bf16.mxu1 %v2234_v11 }
 0x571   :  { %1157 = vmatpush1.bf16.msra.mxu0 %v2237_v12  ;;  %1198 = vmatpush1.bf16.msra.mxu1 %v2240_v13 }
 0x572   :  { %1158 = vmatprep.subr.bf16.mxu0 %v1920_v14  ;;  %1199 = vmatprep.subr.bf16.mxu1 %v1924_v15  ;;  %v1727_v14 = vld [vmem:[#allocation8 + $0xe4] ss:$16 sps:$4 sm:$0xff]   ;;  %v1728_v15 = vld [vmem:[#allocation8 + $0xec] ss:$16 sps:$4 sm:$0xff]  }
 0x575   :  { %1159 = vmatpush1.bf16.msra.mxu0 %v1926_v16  ;;  %1200 = vmatpush1.bf16.msra.mxu1 %v1930_v17 }
 0x576   :  { %1160 = vmatprep.subr.bf16.mxu0 %v1932_v18  ;;  %1201 = vmatprep.subr.bf16.mxu1 %v1936_v19  ;;  %v1000_v18 = vstv %s1521_s19 }
 0x579   :  { %1161 = vmatpush1.bf16.msra.mxu0 %v1938_v20  ;;  %1202 = vmatpush1.bf16.msra.mxu1 %v1940_v21 }
 0x57a   :  { %1162 = vmatprep.subr.bf16.mxu0 %v1944_v22  ;;  %1203 = vmatprep.subr.bf16.mxu1 %v1948_v23  ;;  %v1001_v22 = vmul.f32 %v1000_v18, %v2022_v41 }
 0x57d   :  { %1163 = vmatpush1.bf16.msra.mxu0 %v1952_v24  ;;  %1204 = vmatpush1.bf16.msra.mxu1 %v1954_v25 }
 0x57e   :  { %1164 = vmatprep.subr.bf16.mxu0 %v1958_v26  ;;  %1205 = vmatprep.subr.bf16.mxu1 %v1960_v27 }
 0x581   :  { %1165 = vmatpush1.bf16.msra.mxu0 %v1964_v28  ;;  %1206 = vmatpush1.bf16.msra.mxu1 %v1966_v29 }
 0x582   :  { %1166 = vmatprep.subr.bf16.mxu0 %v1970_v30  ;;  %1207 = vmatprep.subr.bf16.mxu1 %v1972_v31  ;;  %v1002_v30 = vadd.f32 %v1001_v22, %v2030_v49 }
 0x585   :  { %1167 = vmatpush1.bf16.msra.mxu0 %v1976_v32  ;;  %1208 = vmatpush1.bf16.msra.mxu1 %v1978_v33 }
 0x586   :  { %1300 = vmatprep.subr.bf16.mxu0 %v1727_v14  ;;  %1341 = vmatprep.subr.bf16.mxu1 %v1728_v15  ;;  %v1148_v15 = vstv %s1525_s20 }
 0x628   :  { %v1038_v16 = vpop.f32.mrf.mxu0  ;;  %v1079_v17 = vpop.f32.mrf.mxu1 }
 0x62a   :  { %v1040_v19 = vpop.f32.mrf.mxu0  ;;  %v1081_v20 = vpop.f32.mrf.mxu1 }
 0x62b   :  { %v1090_v21 = vcombine.low %v1038_v16, %v1040_v19  ;;  %v1091_v23 = vcombine.low %v1079_v17, %v1081_v20  ;;  %v1749_v19 = vld [vmem:[#allocation7] sm:$0xf] }
 0x62c   :  { %v1042_v24 = vpop.f32.mrf.mxu0  ;;  %v1083_v25 = vpop.f32.mrf.mxu1  ;;  %v1149_v20 = vmul.f32 %v1749_v19, %v1148_v15 }
 0x62d   :  { %v1098_v26 = vrot.slane %v1090_v21, %v2024_v43  ;;  %v1105_v27 = vrot.slane %v1091_v23, %v2024_v43 }
 0x62e   :  { %v1043_v28 = vpop.f32.mrf.mxu0  ;;  %v1084_v29 = vpop.f32.mrf.mxu1 }
 0x62f   :  { %v1106_v31 = vcombine.low %v1098_v26, %v1105_v27  ;;  %v1750_v28 = vld [vmem:[%s2303_s3] sm:$0xf]  ;;  %s1529_s3 = sld [smem:[#allocation3 + $0x7]] }
 0x630   :  { %v1150_v29 = vadd.f32 %v1750_v28, %v1149_v20 }
 0x631   :  { %v1113_v32 = vrot.slane %v1106_v31, %v2024_v43 }
 0x633   :  { %v1115_v33 = vadd.f32 %v1113_v32, %v1002_v30 }
 0x635   :  { %v1522_v45 = vmul.f32 -1.442695, %v1115_v33  ;;  %v1123_v34 = vrot.slane %v1115_v33, 1  ;;  %v1134_v41 = vrot.slane %v1115_v33, 3  ;;  %v1131_v48 = vrot.slane %v1115_v33, 2 }
 0x637   :  { %1669 = vpow2.f32 %v1522_v45  ;;  %v1523_v35 = vmul.f32 -1.442695, %v1123_v34  ;;  %v1524_v1 = vmul.f32 -1.442695, %v1134_v41 }
 0x639   :  { %1671 = vpow2.f32 %v1523_v35 }
 0x63a   :  { %1673 = vpow2.f32 %v1524_v1 }
 0x644   :  { %v1670_v2 = vpop.eup %1669 }
 0x645   :  { %v1119_v36 = vadd.f32 1.0, %v1670_v2 }
 0x646   :  { %v1672_v37 = vpop.eup %1671 }
 0x647   :  { %1675 = vrcp.f32 %v1119_v36  ;;  %v1128_v38 = vadd.f32 1.0, %v1672_v37  ;;  %v1674_v49 = vpop.eup %1673 }
 0x648   :  { %1677 = vtanh.f32 %v1131_v48  ;;  %v1139_v44 = vadd.f32 1.0, %v1674_v49 }
 0x649   :  { %1679 = vrcp.f32 %v1128_v38 }
 0x64a   :  { %1681 = vrcp.f32 %v1139_v44 }
 0x654   :  { %v1676_v39 = vpop.eup %1675 }
 0x655   :  { %v1678_v40 = vpop.eup %1677 }
 0x656   :  { %v1680_v42 = vpop.eup %1679  ;;  %v1143_v47 = vmul.f32 %v1678_v40, %v1676_v39 }
 0x657   :  { %v1142_v46 = vmul.f32 %v1680_v42, %v2208_v60  ;;  %v1682_v51 = vpop.eup %1681  ;;  %v1735_v60 = vld [vmem:[#allocation8 + $0x60] ss:$16 sps:$4 sm:$0xff]  }
 0x659   :  { %v2269_v50 = vadd.f32 %v1143_v47, %v1142_v46 }
 0x65b   :  { %1683 = vtanh.f32 %v2269_v50 }
 0x668   :  { %v1684_v62 = vpop.eup %1683 }
 0x669   :  { %v1146_v52 = vmul.f32 %v1684_v62, %v1682_v51 }
 0x66b   :  { %v1151_v53 = vpack.c.bf16 %v1146_v52, %v1146_v52 }
 0x66d   :  { %1185 = vmatmul.mubr.bf16.vlgmr.msra.gmra.mxu0 %v1151_v53  ;;  %1226 = vmatmul.mubr.bf16.vlgmr.msra.gmra.mxu1 %v1151_v53 }
 0x66e   :  { %1301 = vmatpush1.bf16.msra.mxu0 %v2211_v5  ;;  %1342 = vmatpush1.bf16.msra.mxu1 %v2214_v6  ;;  %v1740_v5 = vld [vmem:[#allocation8 + $0x48] ss:$16 sps:$4 sm:$0xff]   ;;  %v1741_v6 = vld [vmem:[#allocation8 + $0x24] ss:$16 sps:$4 sm:$0xff]  }
 0x66f   :  { %1302 = vmatprep.subr.bf16.mxu0 %v2217_v59  ;;  %1343 = vmatprep.subr.bf16.mxu1 %v2220_v7  ;;  %v1742_v59 = vld [vmem:[#allocation8 + $0x2c] ss:$16 sps:$4 sm:$0xff]   ;;  %v1743_v7 = vld [vmem:[#allocation8 + $0x20] ss:$16 sps:$4 sm:$0xff]  }
 0x670   :  { %1332 = vmatprep.mubr.bf16.mxu0 %v1836_v3  ;;  %1373 = vmatprep.mubr.bf16.mxu1 %v1836_v3  ;;  %v1733_v3 = vld [vmem:[#allocation8 + $0x64] ss:$16 sps:$4 sm:$0xff]  }
 0x672   :  { %1303 = vmatpush1.bf16.msra.mxu0 %v2225_v8  ;;  %1344 = vmatpush1.bf16.msra.mxu1 %v2228_v9  ;;  %v1744_v8 = vld [vmem:[#allocation8 + $0x28] ss:$16 sps:$4 sm:$0xff]   ;;  %v1745_v9 = vld [vmem:[#allocation8 + $0x4] ss:$16 sps:$4 sm:$0xff]  }
 0x673   :  { %1304 = vmatprep.subr.bf16.mxu0 %v2231_v10  ;;  %1345 = vmatprep.subr.bf16.mxu1 %v2234_v11  ;;  %v1746_v10 = vld [vmem:[#allocation8 + $0xc] ss:$16 sps:$4 sm:$0xff]   ;;  %v1747_v11 = vld [vmem:[#allocation8] ss:$16 sps:$4 sm:$0xff]  }
 0x676   :  { %1305 = vmatpush1.bf16.msra.mxu0 %v2237_v12  ;;  %1346 = vmatpush1.bf16.msra.mxu1 %v2240_v13  ;;  %v1748_v12 = vld [vmem:[#allocation8 + $0x8] ss:$16 sps:$4 sm:$0xff]  }
 0x677   :  { %1306 = vmatprep.subr.bf16.mxu0 %v1729_v54  ;;  %1347 = vmatprep.subr.bf16.mxu1 %v1730_v55 }
 0x67a   :  { %1307 = vmatpush1.bf16.msra.mxu0 %v1731_v56  ;;  %1348 = vmatpush1.bf16.msra.mxu1 %v1732_v57  ;;  %v1296_v56 = vstv %s1529_s3 }
 0x67b   :  { %1308 = vmatprep.subr.bf16.mxu0 %v1733_v3  ;;  %1349 = vmatprep.subr.bf16.mxu1 %v1734_v58 }
 0x67e   :  { %1309 = vmatpush1.bf16.msra.mxu0 %v1735_v60  ;;  %1350 = vmatpush1.bf16.msra.mxu1 %v1736_v61  ;;  %v1297_v60 = vmul.f32 %v1749_v19, %v1296_v56 }
 0x67f   :  { %1310 = vmatprep.subr.bf16.mxu0 %v1737_v63  ;;  %1351 = vmatprep.subr.bf16.mxu1 %v1738_v0 }
 0x682   :  { %1311 = vmatpush1.bf16.msra.mxu0 %v1739_v4  ;;  %1352 = vmatpush1.bf16.msra.mxu1 %v1740_v5 }
 0x683   :  { %1312 = vmatprep.subr.bf16.mxu0 %v1741_v6  ;;  %1353 = vmatprep.subr.bf16.mxu1 %v1742_v59  ;;  %v1298_v59 = vadd.f32 %v1750_v28, %v1297_v60 }
 0x686   :  { %1313 = vmatpush1.bf16.msra.mxu0 %v1743_v7  ;;  %1354 = vmatpush1.bf16.msra.mxu1 %v1744_v8 }
 0x687   :  { %1314 = vmatprep.subr.bf16.mxu0 %v1745_v9  ;;  %1355 = vmatprep.subr.bf16.mxu1 %v1746_v10 }
 0x68a   :  { %1315 = vmatpush1.bf16.msra.mxu0 %v1747_v11  ;;  %1356 = vmatpush1.bf16.msra.mxu1 %v1748_v12 }
 0x72d   :  { %v1186_v13 = vpop.f32.mrf.mxu0  ;;  %v1227_v14 = vpop.f32.mrf.mxu1 }
 0x72f   :  { %v1188_v16 = vpop.f32.mrf.mxu0  ;;  %v1229_v17 = vpop.f32.mrf.mxu1 }
 0x730   :  { %v1238_v18 = vcombine.low %v1186_v13, %v1188_v16  ;;  %v1239_v21 = vcombine.low %v1227_v14, %v1229_v17 }
 0x731   :  { %v1190_v22 = vpop.f32.mrf.mxu0  ;;  %v1231_v23 = vpop.f32.mrf.mxu1 }
 0x732   :  { %v1246_v24 = vrot.slane %v1238_v18, %v2024_v43  ;;  %v1253_v25 = vrot.slane %v1239_v21, %v2024_v43 }
 0x733   :  { %v1191_v26 = vpop.f32.mrf.mxu0  ;;  %v1232_v27 = vpop.f32.mrf.mxu1 }
 0x734   :  { %v1254_v30 = vcombine.low %v1246_v24, %v1253_v25 }
 0x736   :  { %v1261_v31 = vrot.slane %v1254_v30, %v2024_v43 }
 0x738   :  { %v1263_v32 = vadd.f32 %v1261_v31, %v1150_v29  ;;  %v1443_v29 = vld [vmem:[%s2304_s4] sm:$0x1] }
 0x73a   :  { %v1526_v33 = vmul.f32 -1.442695, %v1263_v32  ;;  %v1271_v45 = vrot.slane %v1263_v32, 1  ;;  %v1282_v35 = vrot.slane %v1263_v32, 3  ;;  %v1279_v2 = vrot.slane %v1263_v32, 2 }
 0x73c   :  { %1685 = vpow2.f32 %v1526_v33  ;;  %v1527_v34 = vmul.f32 -1.442695, %v1271_v45  ;;  %v1528_v41 = vmul.f32 -1.442695, %v1282_v35  ;;  %v1449_v33 = vld [vmem:[#allocation2] sm:$0x1] }
 0x73e   :  { %1687 = vpow2.f32 %v1527_v34 }
 0x73f   :  { %1689 = vpow2.f32 %v1528_v41 }
 0x749   :  { %v1686_v1 = vpop.eup %1685 }
 0x74a   :  { %v1267_v48 = vadd.f32 1.0, %v1686_v1 }
 0x74b   :  { %v1688_v36 = vpop.eup %1687 }
 0x74c   :  { %1691 = vrcp.f32 %v1267_v48  ;;  %v1276_v37 = vadd.f32 1.0, %v1688_v36  ;;  %v1690_v38 = vpop.eup %1689 }
 0x74d   :  { %1693 = vtanh.f32 %v1279_v2  ;;  %v1287_v42 = vadd.f32 1.0, %v1690_v38 }
 0x74e   :  { %1695 = vrcp.f32 %v1276_v37 }
 0x74f   :  { %1697 = vrcp.f32 %v1287_v42 }
 0x759   :  { %v1692_v49 = vpop.eup %1691 }
 0x75a   :  { %v1694_v39 = vpop.eup %1693 }
 0x75b   :  { %v1696_v40 = vpop.eup %1695  ;;  %v1291_v46 = vmul.f32 %v1694_v39, %v1692_v49 }
 0x75c   :  { %v1290_v44 = vmul.f32 %v1696_v40, %v2269_v50  ;;  %v1698_v51 = vpop.eup %1697 }
 0x75e   :  { %v1292_v47 = vadd.f32 %v1291_v46, %v1290_v44 }
 0x760   :  { %1699 = vtanh.f32 %v1292_v47 }
 0x76d   :  { %v1700_v62 = vpop.eup %1699 }
 0x76e   :  { %v1294_v52 = vmul.f32 %v1700_v62, %v1698_v51 }
 0x770   :  { %v1299_v53 = vpack.c.bf16 %v1294_v52, %v1294_v52 }
 0x772   :  { %1333 = vmatmul.mubr.bf16.vlgmr.msra.gmra.mxu0 %v1299_v53  ;;  %1374 = vmatmul.mubr.bf16.vlgmr.msra.gmra.mxu1 %v1299_v53 }
 0x832   :  { %v1334_v54 = vpop.f32.mrf.mxu0  ;;  %v1375_v55 = vpop.f32.mrf.mxu1 }
 0x834   :  { %v1336_v57 = vpop.f32.mrf.mxu0  ;;  %v1377_v3 = vpop.f32.mrf.mxu1 }
 0x835   :  { %v1386_v58 = vcombine.low %v1334_v54, %v1336_v57  ;;  %v1387_v61 = vcombine.low %v1375_v55, %v1377_v3 }
 0x836   :  { %v1338_v50 = vpop.f32.mrf.mxu0  ;;  %v1379_v63 = vpop.f32.mrf.mxu1 }
 0x837   :  { %v1394_v0 = vrot.slane %v1386_v58, %v2024_v43  ;;  %v1401_v4 = vrot.slane %v1387_v61, %v2024_v43 }
 0x838   :  { %v1339_v5 = vpop.f32.mrf.mxu0  ;;  %v1380_v6 = vpop.f32.mrf.mxu1 }
 0x839   :  { %v1402_v7 = vcombine.low %v1394_v0, %v1401_v4 }
 0x83b   :  { %v1409_v8 = vrot.slane %v1402_v7, %v2024_v43 }
 0x83d   :  { %v1411_v9 = vadd.f32 %v1409_v8, %v1298_v59 }
 0x83f   :  { %v1530_v10 = vmul.f32 -1.442695, %v1411_v9  ;;  %v1419_v11 = vrot.slane %v1411_v9, 1  ;;  %v1430_v13 = vrot.slane %v1411_v9, 3  ;;  %v1427_v16 = vrot.slane %v1411_v9, 2 }
 0x841   :  { %1701 = vpow2.f32 %v1530_v10  ;;  %v1531_v12 = vmul.f32 -1.442695, %v1419_v11  ;;  %v1532_v14 = vmul.f32 -1.442695, %v1430_v13 }
 0x843   :  { %1703 = vpow2.f32 %v1531_v12 }
 0x844   :  { %1705 = vpow2.f32 %v1532_v14 }
 0x84e   :  { %v1702_v15 = vpop.eup %1701 }
 0x84f   :  { %v1415_v17 = vadd.f32 1.0, %v1702_v15 }
 0x850   :  { %v1704_v18 = vpop.eup %1703 }
 0x851   :  { %1707 = vrcp.f32 %v1415_v17  ;;  %v1424_v19 = vadd.f32 1.0, %v1704_v18  ;;  %v1706_v20 = vpop.eup %1705 }
 0x852   :  { %1709 = vtanh.f32 %v1427_v16  ;;  %v1435_v23 = vadd.f32 1.0, %v1706_v20 }
 0x853   :  { %1711 = vrcp.f32 %v1424_v19 }
 0x854   :  { %1713 = vrcp.f32 %v1435_v23 }
 0x85e   :  { %v1708_v21 = vpop.eup %1707 }
 0x85f   :  { %v1710_v43 = vpop.eup %1709 }
 0x860   :  { %v1712_v22 = vpop.eup %1711  ;;  %v1439_v25 = vmul.f32 %v1710_v43, %v1708_v21 }
 0x861   :  { %v1438_v24 = vmul.f32 %v1712_v22, %v1292_v47  ;;  %v1714_v27 = vpop.eup %1713 }
 0x863   :  { %v1440_v26 = vadd.f32 %v1439_v25, %v1438_v24 }
 0x865   :  { %1715 = vtanh.f32 %v1440_v26 }
 0x872   :  { %v1716_v28 = vpop.eup %1715 }
 0x873   :  { %v1442_v30 = vmul.f32 %v1716_v28, %v1714_v27 }
 0x875   :  { %v1444_v31 = vmul.f32 %v1443_v29, %v1442_v30 }
 0x877   :  { %v1446_v32 = vsel %vm1445_vm0, %v1444_v31, 0.0 }
 0x878   :  { %1447 = vadd.xlane.f32.xlu0 %v1446_v32 }
 0x901   :  { %v1448_v45 = vpop.xlane.xlu0 %1447 }
 0x902   :  { %v1450_v34 = vadd.f32 %v1449_v33, %v1448_v45 }
 0x904   :  { %1452 = vst.msk [vmem:[#allocation10] sm:$0x1] %vm1451_vm1, %v1450_v34 }
 0x905   :  { %1814 = shalt.err (!%p1811_p5)
}
 0x906   :  { %1462 = dma.vmem_to_hbm [thread:$0]  %s1460_s26, 16, %s2306_s6, [#allocation5]  }
 0x907   :  { %1829 = dma.done.wait [#allocation5], 16  }
 0x908   :  { %1830 = vsyncadd [#allocation5], 4294967280 }
 0x909   :  { %1466 = vsyncpa [#allocation4], 1 }
 0x90a   :  { %1467 = vsyncpa [#allocation9], 1 }
 0x90b   :  { %1468 = vsyncpa [#allocation5], 1 }
 0x90c   :  { %1469 = vsyncpa [#allocation6], 1 }

</bundles_post_ra>
